<compile_context>
chip_gen: v6e
topology: v6e:2x2x1
jax: 0.10.0
libtpu: 0.0.40
codegen_flags: <defaults>
</compile_context>

<pallas_src>
import jax
import jax.numpy as jnp
from jax import lax
from jax.experimental import pallas as pl
from jax.experimental.pallas import tpu as pltpu

EPS = 1e-5  # PyTorch BatchNorm2d default


def _vmem_limit_bytes():
    """Generation-aware VMEM limit (leave headroom for double buffers)."""
    cap = 32 * 1024 * 1024
    try:
        info = pltpu.get_tpu_info()
        cap = int(getattr(info, "vmem_capacity_bytes", cap))
    except Exception:
        pass
    # ~48 MiB on 64 MiB parts (v7x), ~96-100 MiB on 128 MiB parts (v5e/v6e).
    return min(cap * 3 // 4, 100 * 1024 * 1024)


def _pick_rows_per_tile(H, W, cin, cout, budget_bytes):
    """Largest row-tile Ht (divisor of H) whose double-buffered working set
    fits the budget; lane extents must be 128-aligned (or full) and the
    output sublane extent 2*Ht must be 8-aligned (or full)."""
    cands = [ht for ht in range(1, H + 1)
             if H % ht == 0
             and ((ht * W) % 128 == 0 or ht == H)
             and (ht % 4 == 0 or ht == H)]
    best = min(cands)
    for ht in sorted(cands):
        x_b = cin * ht * W * 4            # f32 input block
        y_b = 4 * cout * ht * W * 4       # f32 conv values (live in VMEM/vregs)
        o_b = cout * 2 * ht * 2 * W * 4   # f32 output block
        if 2 * (x_b + o_b) + 2 * y_b <= budget_bytes:
            best = ht
    return best


def _build_phase_weight(w_t, dtype):
    """Merged sub-pixel weight for ConvTranspose2d(k=2, s=2, p=0):
         out[n, oc, 2i+p, 2j+q] = sum_ic x[n, ic, i, j] * w_t[ic, oc, p, q]
       Rows ordered (q, p, oc):  W_all[(2q+p)*Cout + oc, ic] = w_t[ic, oc, p, q]."""
    blocks = []
    for q in (0, 1):
        for p in (0, 1):
            blocks.append(w_t[:, :, p, q].T.astype(dtype))   # (Cout, Cin)
    return jnp.concatenate(blocks, axis=0)                    # (4*Cout, Cin)


def up_forward(x_nchw, w_t, gamma, beta):
    """x_nchw: (N, Cin, H, W) f32; w_t: (Cin, Cout, 2, 2) ConvTranspose2d layout."""
    N, Cin, H, W = x_nchw.shape
    Cout = w_t.shape[1]
    HW, OW = H * W, 2 * W
    C4 = 4 * Cout

    vmem_limit = _vmem_limit_bytes()
    Ht = _pick_rows_per_tile(H, W, Cin, Cout, int(vmem_limit * 0.7))
    n_t = H // Ht

    x_flat = x_nchw.reshape(N, Cin, HW)              # free reshape, stays f32
    w_all = _build_phase_weight(w_t, jnp.bfloat16)   # (4*Cout, Cin), tiny

    cparams = pltpu.CompilerParams(
        dimension_semantics=("parallel", "parallel"),
        vmem_limit_bytes=vmem_limit)

    conv_flops = 2 * N * C4 * Cin * HW
    inter_flops = 16 * N * Cout * H * W * W          # 0/1 interleave matmuls
    x_bytes = N * Cin * HW * 4
    out_bytes = N * Cout * 4 * HW * 4
    w_bytes = C4 * Cin * 2

    # ---- stage 1: conv recomputed on the fly -> per-tile BN partial sums ----
    def conv_stats_kernel(x_ref, w_ref, s_ref):
        x = x_ref[0].astype(jnp.bfloat16)                               # (Cin, Ht*W)
        y = jnp.dot(w_ref[...], x, preferred_element_type=jnp.float32)  # (4C, Ht*W)
        s1 = jnp.sum(y, axis=1, keepdims=True)                          # (4C, 1)
        s2 = jnp.sum(y * y, axis=1, keepdims=True)
        s1 = (s1[0:Cout] + s1[Cout:2 * Cout]
              + s1[2 * Cout:3 * Cout] + s1[3 * Cout:4 * Cout])          # (Cout, 1)
        s2 = (s2[0:Cout] + s2[Cout:2 * Cout]
              + s2[2 * Cout:3 * Cout] + s2[3 * Cout:4 * Cout])
        s_ref[0, 0] = jnp.concatenate([s1, s2], axis=1)                 # (Cout, 2)

    stats = pl.pallas_call(
        conv_stats_kernel,
        grid=(N, n_t),
        in_specs=[
            pl.BlockSpec((1, Cin, Ht * W), lambda n, t: (n, 0, t)),
            pl.BlockSpec((C4, Cin), lambda n, t: (0, 0)),
        ],
        out_specs=pl.BlockSpec((1, 1, Cout, 2), lambda n, t: (n, t, 0, 0)),
        out_shape=jax.ShapeDtypeStruct((N, n_t, Cout, 2), jnp.float32),
        compiler_params=cparams,
        cost_estimate=pl.CostEstimate(
            flops=conv_flops, transcendentals=0,
            bytes_accessed=x_bytes + w_bytes + N * n_t * Cout * 2 * 4),
    )(x_flat, w_all)

    # ---- fold the tiny cross-tile reduction into per-channel scale/shift ----
    tot = jnp.sum(stats, axis=(0, 1))                        # (Cout, 2)
    count = jnp.float32(N * 4 * HW)
    mean = tot[:, 0] / count
    var = jnp.maximum(tot[:, 1] / count - mean * mean, 0.0)  # biased (training BN)
    inv = lax.rsqrt(var + EPS)
    scale = gamma.astype(jnp.float32) * inv
    shift = beta.astype(jnp.float32) - mean * scale
    ss = jnp.stack([jnp.tile(scale, 4), jnp.tile(shift, 4)], axis=1)  # (4*Cout, 2)

    # ---- stage 2: recompute conv, BN + ReLU, fused depth-to-space store -----
    def conv_bn_relu_d2s_kernel(x_ref, w_ref, ss_ref, o_ref):
        x = x_ref[0].astype(jnp.bfloat16)                               # (Cin, Ht*W)
        y = jnp.dot(w_ref[...], x, preferred_element_type=jnp.float32)  # (4C, Ht*W)
        y = jnp.maximum(y * ss_ref[:, 0:1] + ss_ref[:, 1:2], 0.0)       # BN + ReLU
        # 0/1 width-interleave matrices (exact selection), built in-kernel.
        lane = lax.broadcasted_iota(jnp.int32, (W, OW), 1)
        row = lax.broadcasted_iota(jnp.int32, (W, OW), 0)
        e0 = (lane == 2 * row).astype(jnp.float32)        # out col 2j   <- col j
        e1 = (lane == 2 * row + 1).astype(jnp.float32)    # out col 2j+1 <- col j
        for i in range(Ht):                               # static, fully unrolled
            a = y[0:2 * Cout, i * W:(i + 1) * W]          # q = 0 taps, rows (p, oc)
            b = y[2 * Cout:4 * Cout, i * W:(i + 1) * W]   # q = 1 taps
            z = (jnp.dot(a, e0, preferred_element_type=jnp.float32)
                 + jnp.dot(b, e1, preferred_element_type=jnp.float32))  # (2C, 2W)
            o_ref[0, :, 2 * i, :] = z[0:Cout]             # output row 2*i   (p=0)
            o_ref[0, :, 2 * i + 1, :] = z[Cout:2 * Cout]  # output row 2*i+1 (p=1)

    out = pl.pallas_call(
        conv_bn_relu_d2s_kernel,
        grid=(N, n_t),
        in_specs=[
            pl.BlockSpec((1, Cin, Ht * W), lambda n, t: (n, 0, t)),
            pl.BlockSpec((C4, Cin), lambda n, t: (0, 0)),
            pl.BlockSpec((C4, 2), lambda n, t: (0, 0)),
        ],
        out_specs=pl.BlockSpec((1, Cout, 2 * Ht, OW), lambda n, t: (n, 0, t, 0)),
        out_shape=jax.ShapeDtypeStruct((N, Cout, 2 * H, OW), jnp.float32),
        compiler_params=cparams,
        cost_estimate=pl.CostEstimate(
            flops=conv_flops + inter_flops, transcendentals=0,
            bytes_accessed=x_bytes + out_bytes + w_bytes + C4 * 2 * 4),
    )(x_flat, w_all, ss)

    return out  # already (N, Cout, 2H, 2W) NCHW -- no epilogue passes


def up_reference(x, w_t, gamma, beta):
    """Pure-JAX reference: ConvTranspose2d(k=2, s=2, bias=False) -> BatchNorm2d
    (training batch stats) -> ReLU, with bf16-rounded matmul operands (f32 acc)
    to match the kernel's MXU precision."""
    xb = x.astype(jnp.bfloat16).astype(jnp.float32)
    wb = w_t.astype(jnp.bfloat16).astype(jnp.float32)
    y = jnp.einsum('nchw,cdpq->ndhpwq', xb, wb,
                   preferred_element_type=jnp.float32)     # (N, Cout, H, 2, W, 2)
    n, cout, h, _, w, _ = y.shape
    y = y.reshape(n, cout, 2 * h, 2 * w)
    mean = jnp.mean(y, axis=(0, 2, 3), keepdims=True)
    var = jnp.mean((y - mean) ** 2, axis=(0, 2, 3), keepdims=True)
    yn = (y - mean) * lax.rsqrt(var + EPS)
    yn = yn * gamma.reshape(1, -1, 1, 1) + beta.reshape(1, -1, 1, 1)
    return jnp.maximum(yn, 0.0)


if __name__ == "__main__":
    # Shapes consistent with MSFF2(base_dim=4): channel3 = 60 -> channels[0] = 4.
    BASE_DIM = 4
    channels = [BASE_DIM * 2 ** i for i in range(4)]
    C_IN = sum(channels)          # channel3 = (c0+c1) + (c2+c3) = 60
    C_OUT = channels[0]           # 4
    N, H, W = 2, 16, 16

    key = jax.random.PRNGKey(0)
    kx, kw = jax.random.split(key)
    x = jax.random.normal(kx, (N, C_IN, H, W), dtype=jnp.float32)
    # ConvTranspose2d weight layout: (in_channels, out_channels, kH, kW)
    w_t = jax.random.normal(kw, (C_IN, C_OUT, 2, 2), dtype=jnp.float32) * 0.1
    gamma = jnp.ones((C_OUT,), dtype=jnp.float32)   # BatchNorm2d default init
    beta = jnp.zeros((C_OUT,), dtype=jnp.float32)

    up = jax.jit(up_forward)
    out = up(x, w_t, gamma, beta)
    jax.block_until_ready(out)

    ref = up_reference(x, w_t, gamma, beta)
    assert out.shape == (N, C_OUT, 2 * H, 2 * W), out.shape
    max_err = float(jnp.max(jnp.abs(out - ref)))
    # Same bf16-operand / f32-accumulate rounding on both sides; only
    # accumulation-order and sum/sum-of-squares-variance differences remain.
    assert jnp.allclose(out, ref, rtol=2e-3, atol=2e-3), max_err

    print("KERNEL_OK")
</pallas_src>

<mosaic_0001>
module attributes {stable_mosaic.version = 11 : i64} {
  func.func @conv_stats_kernel(%arg0: i32, %arg1: i32, %arg2: memref<1x60x256xf32, #tpu.memory_space<vmem>>, %arg3: memref<16x60xbf16, #tpu.memory_space<vmem>>, %arg4: memref<1x1x4x2xf32, #tpu.memory_space<vmem>>) attributes {dimension_semantics = [#tpu.dimension_semantics<parallel>, #tpu.dimension_semantics<parallel>], iteration_bounds = array<i64: 2, 1>, scalar_prefetch = 0 : i64, scratch_operands = 0 : i64, tpu.core_type = #tpu.core_type<tc>, window_params = [{transform_indices = @transform_0, window_bounds = array<i64: 1, 60, 256>}, {pipeline_mode = #tpu.pipeline_mode<synchronous>, transform_indices = @transform_1, window_bounds = array<i64: 16, 60>}, {transform_indices = @transform_2, window_bounds = array<i64: 1, 1, 4, 2>}]} {
    %c0 = arith.constant 0 : index
    %c0_0 = arith.constant 0 : index
    %c0_1 = arith.constant 0 : index
    %0 = vector.load %arg2[%c0, %c0_0, %c0_1] : memref<1x60x256xf32, #tpu.memory_space<vmem>>, vector<1x60x256xf32>
    %1 = vector.shape_cast %0 : vector<1x60x256xf32> to vector<60x256xf32>
    %2 = arith.truncf %1 : vector<60x256xf32> to vector<60x256xbf16>
    %c0_2 = arith.constant 0 : index
    %c0_3 = arith.constant 0 : index
    %3 = vector.load %arg3[%c0_2, %c0_3] : memref<16x60xbf16, #tpu.memory_space<vmem>>, vector<16x60xbf16>
    %cst = arith.constant dense<0.000000e+00> : vector<16x256xf32>
    %4 = tpu.matmul %3, %2, %cst {dimension_numbers = #tpu.dot_dimension_numbers<[1], [0], [0], [1], [0, 0, 1, 1], [], []>} : vector<16x60xbf16>, vector<60x256xbf16>, vector<16x256xf32> -> vector<16x256xf32>
    %cst_4 = arith.constant dense<0.000000e+00> : vector<16xf32>
    %5 = vector.multi_reduction <add>, %4, %cst_4 [1] : vector<16x256xf32> to vector<16xf32>
    %6 = vector.shape_cast %5 : vector<16xf32> to vector<16x1xf32>
    %7 = arith.mulf %4, %4 : vector<16x256xf32>
    %cst_5 = arith.constant dense<0.000000e+00> : vector<16xf32>
    %8 = vector.multi_reduction <add>, %7, %cst_5 [1] : vector<16x256xf32> to vector<16xf32>
    %9 = vector.shape_cast %8 : vector<16xf32> to vector<16x1xf32>
    %10 = vector.extract_strided_slice %6 {offsets = [0, 0], sizes = [4, 1], strides = [1, 1]} : vector<16x1xf32> to vector<4x1xf32>
    %11 = vector.extract_strided_slice %6 {offsets = [4, 0], sizes = [4, 1], strides = [1, 1]} : vector<16x1xf32> to vector<4x1xf32>
    %12 = arith.addf %10, %11 : vector<4x1xf32>
    %13 = vector.extract_strided_slice %6 {offsets = [8, 0], sizes = [4, 1], strides = [1, 1]} : vector<16x1xf32> to vector<4x1xf32>
    %14 = arith.addf %12, %13 : vector<4x1xf32>
    %15 = vector.extract_strided_slice %6 {offsets = [12, 0], sizes = [4, 1], strides = [1, 1]} : vector<16x1xf32> to vector<4x1xf32>
    %16 = arith.addf %14, %15 : vector<4x1xf32>
    %17 = vector.extract_strided_slice %9 {offsets = [0, 0], sizes = [4, 1], strides = [1, 1]} : vector<16x1xf32> to vector<4x1xf32>
    %18 = vector.extract_strided_slice %9 {offsets = [4, 0], sizes = [4, 1], strides = [1, 1]} : vector<16x1xf32> to vector<4x1xf32>
    %19 = arith.addf %17, %18 : vector<4x1xf32>
    %20 = vector.extract_strided_slice %9 {offsets = [8, 0], sizes = [4, 1], strides = [1, 1]} : vector<16x1xf32> to vector<4x1xf32>
    %21 = arith.addf %19, %20 : vector<4x1xf32>
    %22 = vector.extract_strided_slice %9 {offsets = [12, 0], sizes = [4, 1], strides = [1, 1]} : vector<16x1xf32> to vector<4x1xf32>
    %23 = arith.addf %21, %22 : vector<4x1xf32>
    %24 = tpu.concatenate %16, %23 in 1 : vector<4x1xf32>, vector<4x1xf32> -> vector<4x2xf32>
    %c0_6 = arith.constant 0 : index
    %c0_7 = arith.constant 0 : index
    %c0_8 = arith.constant 0 : index
    %c0_9 = arith.constant 0 : index
    %25 = vector.load %arg4[%c0_6, %c0_7, %c0_8, %c0_9] : memref<1x1x4x2xf32, #tpu.memory_space<vmem>>, vector<1x1x4x2xf32>
    %26 = vector.shape_cast %25 : vector<1x1x4x2xf32> to vector<4x2xf32>
    %27 = vector.shape_cast %24 : vector<4x2xf32> to vector<1x1x4x2xf32>
    tpu.vector_store %arg4[%c0_6, %c0_7, %c0_8, %c0_9], %27 {strides = array<i32>} : memref<1x1x4x2xf32, #tpu.memory_space<vmem>>, vector<1x1x4x2xf32>,
    return
  }
  func.func @transform_0(%arg0: i32, %arg1: i32) -> (i32, i32, i32) {
    %c0_i32 = arith.constant 0 : i32
    %c0_i32_0 = arith.constant 0 : i32
    return %arg0, %c0_i32, %arg1 : i32, i32, i32
  }
  func.func @transform_1(%arg0: i32, %arg1: i32) -> (i32, i32) {
    %c0_i32 = arith.constant 0 : i32
    %c0_i32_0 = arith.constant 0 : i32
    %c0_i32_1 = arith.constant 0 : i32
    return %c0_i32, %c0_i32_0 : i32, i32
  }
  func.func @transform_2(%arg0: i32, %arg1: i32) -> (i32, i32, i32, i32) {
    %c0_i32 = arith.constant 0 : i32
    %c0_i32_0 = arith.constant 0 : i32
    %c0_i32_1 = arith.constant 0 : i32
    return %arg0, %arg1, %c0_i32, %c0_i32_0 : i32, i32, i32, i32
  }
}

module attributes {stable_mosaic.version = 11 : i64} {
  func.func @conv_bn_relu_d2s_kernel(%arg0: i32, %arg1: i32, %arg2: memref<1x60x256xf32, #tpu.memory_space<vmem>>, %arg3: memref<16x60xbf16, #tpu.memory_space<vmem>>, %arg4: memref<16x2xf32, #tpu.memory_space<vmem>>, %arg5: memref<1x4x32x32xf32, #tpu.memory_space<vmem>>) attributes {dimension_semantics = [#tpu.dimension_semantics<parallel>, #tpu.dimension_semantics<parallel>], iteration_bounds = array<i64: 2, 1>, scalar_prefetch = 0 : i64, scratch_operands = 0 : i64, tpu.core_type = #tpu.core_type<tc>, window_params = [{transform_indices = @transform_0, window_bounds = array<i64: 1, 60, 256>}, {pipeline_mode = #tpu.pipeline_mode<synchronous>, transform_indices = @transform_1, window_bounds = array<i64: 16, 60>}, {pipeline_mode = #tpu.pipeline_mode<synchronous>, transform_indices = @transform_2, window_bounds = array<i64: 16, 2>}, {transform_indices = @transform_3, window_bounds = array<i64: 1, 4, 32, 32>}]} {
    %c0 = arith.constant 0 : index
    %c0_0 = arith.constant 0 : index
    %c0_1 = arith.constant 0 : index
    %0 = vector.load %arg2[%c0, %c0_0, %c0_1] : memref<1x60x256xf32, #tpu.memory_space<vmem>>, vector<1x60x256xf32>
    %1 = vector.shape_cast %0 : vector<1x60x256xf32> to vector<60x256xf32>
    %2 = arith.truncf %1 : vector<60x256xf32> to vector<60x256xbf16>
    %c0_2 = arith.constant 0 : index
    %c0_3 = arith.constant 0 : index
    %3 = vector.load %arg3[%c0_2, %c0_3] : memref<16x60xbf16, #tpu.memory_space<vmem>>, vector<16x60xbf16>
    %cst = arith.constant dense<0.000000e+00> : vector<16x256xf32>
    %4 = tpu.matmul %3, %2, %cst {dimension_numbers = #tpu.dot_dimension_numbers<[1], [0], [0], [1], [0, 0, 1, 1], [], []>} : vector<16x60xbf16>, vector<60x256xbf16>, vector<16x256xf32> -> vector<16x256xf32>
    %c0_4 = arith.constant 0 : index
    %c0_5 = arith.constant 0 : index
    %5 = vector.load %arg4[%c0_4, %c0_5] : memref<16x2xf32, #tpu.memory_space<vmem>>, vector<16x1xf32>
    %6 = vector.broadcast %5 : vector<16x1xf32> to vector<16x256xf32>
    %7 = arith.mulf %4, %6 : vector<16x256xf32>
    %c0_6 = arith.constant 0 : index
    %c1 = arith.constant 1 : index
    %8 = vector.load %arg4[%c0_6, %c1] : memref<16x2xf32, #tpu.memory_space<vmem>>, vector<16x1xf32>
    %9 = vector.broadcast %8 : vector<16x1xf32> to vector<16x256xf32>
    %10 = arith.addf %7, %9 : vector<16x256xf32>
    %cst_7 = arith.constant 0.000000e+00 : f32
    %11 = vector.broadcast %cst_7 : f32 to vector<16x256xf32>
    %12 = arith.maximumf %10, %11 : vector<16x256xf32>
    %13 = tpu.iota {dimensions = array<i32: 1>} : vector<16x32xi32>
    %14 = tpu.iota {dimensions = array<i32: 0>} : vector<16x32xi32>
    %c2_i32 = arith.constant 2 : i32
    %15 = vector.broadcast %c2_i32 : i32 to vector<16x32xi32>
    %16 = arith.muli %15, %14 : vector<16x32xi32>
    %17 = arith.cmpi eq, %13, %16 : vector<16x32xi32>
    %18 = arith.extui %17 : vector<16x32xi1> to vector<16x32xi32>
    %19 = arith.sitofp %18 : vector<16x32xi32> to vector<16x32xf32>
    %c2_i32_8 = arith.constant 2 : i32
    %20 = vector.broadcast %c2_i32_8 : i32 to vector<16x32xi32>
    %21 = arith.muli %20, %14 : vector<16x32xi32>
    %c1_i32 = arith.constant 1 : i32
    %22 = vector.broadcast %c1_i32 : i32 to vector<16x32xi32>
    %23 = arith.addi %21, %22 : vector<16x32xi32>
    %24 = arith.cmpi eq, %13, %23 : vector<16x32xi32>
    %25 = arith.extui %24 : vector<16x32xi1> to vector<16x32xi32>
    %26 = arith.sitofp %25 : vector<16x32xi32> to vector<16x32xf32>
    %27 = vector.extract_strided_slice %12 {offsets = [0, 0], sizes = [8, 16], strides = [1, 1]} : vector<16x256xf32> to vector<8x16xf32>
    %28 = vector.extract_strided_slice %12 {offsets = [8, 0], sizes = [8, 16], strides = [1, 1]} : vector<16x256xf32> to vector<8x16xf32>
    %cst_9 = arith.constant dense<0.000000e+00> : vector<8x32xf32>
    %29 = tpu.matmul %27, %19, %cst_9 {dimension_numbers = #tpu.dot_dimension_numbers<[1], [0], [0], [1], [0, 0, 1, 1], [], []>} : vector<8x16xf32>, vector<16x32xf32>, vector<8x32xf32> -> vector<8x32xf32>
    %cst_10 = arith.constant dense<0.000000e+00> : vector<8x32xf32>
    %30 = tpu.matmul %28, %26, %cst_10 {dimension_numbers = #tpu.dot_dimension_numbers<[1], [0], [0], [1], [0, 0, 1, 1], [], []>} : vector<8x16xf32>, vector<16x32xf32>, vector<8x32xf32> -> vector<8x32xf32>
    %31 = arith.addf %29, %30 : vector<8x32xf32>
    %32 = vector.extract_strided_slice %31 {offsets = [0, 0], sizes = [4, 32], strides = [1, 1]} : vector<8x32xf32> to vector<4x32xf32>
    %c0_11 = arith.constant 0 : index
    %c0_12 = arith.constant 0 : index
    %c0_13 = arith.constant 0 : index
    %c0_14 = arith.constant 0 : index
    %33 = vector.load %arg5[%c0_11, %c0_12, %c0_13, %c0_14] : memref<1x4x32x32xf32, #tpu.memory_space<vmem>>, vector<1x4x1x32xf32>
    %34 = vector.shape_cast %33 : vector<1x4x1x32xf32> to vector<4x32xf32>
    %35 = vector.shape_cast %32 : vector<4x32xf32> to vector<1x4x1x32xf32>
    tpu.vector_store %arg5[%c0_11, %c0_12, %c0_13, %c0_14], %35 {strides = array<i32>} : memref<1x4x32x32xf32, #tpu.memory_space<vmem>>, vector<1x4x1x32xf32>,
    %36 = vector.extract_strided_slice %31 {offsets = [4, 0], sizes = [4, 32], strides = [1, 1]} : vector<8x32xf32> to vector<4x32xf32>
    %c0_15 = arith.constant 0 : index
    %c0_16 = arith.constant 0 : index
    %c1_17 = arith.constant 1 : index
    %c0_18 = arith.constant 0 : index
    %37 = vector.load %arg5[%c0_15, %c0_16, %c1_17, %c0_18] : memref<1x4x32x32xf32, #tpu.memory_space<vmem>>, vector<1x4x1x32xf32>
    %38 = vector.shape_cast %37 : vector<1x4x1x32xf32> to vector<4x32xf32>
    %39 = vector.shape_cast %36 : vector<4x32xf32> to vector<1x4x1x32xf32>
    tpu.vector_store %arg5[%c0_15, %c0_16, %c1_17, %c0_18], %39 {strides = array<i32>} : memref<1x4x32x32xf32, #tpu.memory_space<vmem>>, vector<1x4x1x32xf32>,
    %40 = vector.extract_strided_slice %12 {offsets = [0, 16], sizes = [8, 16], strides = [1, 1]} : vector<16x256xf32> to vector<8x16xf32>
    %41 = vector.extract_strided_slice %12 {offsets = [8, 16], sizes = [8, 16], strides = [1, 1]} : vector<16x256xf32> to vector<8x16xf32>
    %cst_19 = arith.constant dense<0.000000e+00> : vector<8x32xf32>
    %42 = tpu.matmul %40, %19, %cst_19 {dimension_numbers = #tpu.dot_dimension_numbers<[1], [0], [0], [1], [0, 0, 1, 1], [], []>} : vector<8x16xf32>, vector<16x32xf32>, vector<8x32xf32> -> vector<8x32xf32>
    %cst_20 = arith.constant dense<0.000000e+00> : vector<8x32xf32>
    %43 = tpu.matmul %41, %26, %cst_20 {dimension_numbers = #tpu.dot_dimension_numbers<[1], [0], [0], [1], [0, 0, 1, 1], [], []>} : vector<8x16xf32>, vector<16x32xf32>, vector<8x32xf32> -> vector<8x32xf32>
    %44 = arith.addf %42, %43 : vector<8x32xf32>
    %45 = vector.extract_strided_slice %44 {offsets = [0, 0], sizes = [4, 32], strides = [1, 1]} : vector<8x32xf32> to vector<4x32xf32>
    %c0_21 = arith.constant 0 : index
    %c0_22 = arith.constant 0 : index
    %c2 = arith.constant 2 : index
    %c0_23 = arith.constant 0 : index
    %46 = vector.load %arg5[%c0_21, %c0_22, %c2, %c0_23] : memref<1x4x32x32xf32, #tpu.memory_space<vmem>>, vector<1x4x1x32xf32>
    %47 = vector.shape_cast %46 : vector<1x4x1x32xf32> to vector<4x32xf32>
    %48 = vector.shape_cast %45 : vector<4x32xf32> to vector<1x4x1x32xf32>
    tpu.vector_store %arg5[%c0_21, %c0_22, %c2, %c0_23], %48 {strides = array<i32>} : memref<1x4x32x32xf32, #tpu.memory_space<vmem>>, vector<1x4x1x32xf32>,
    %49 = vector.extract_strided_slice %44 {offsets = [4, 0], sizes = [4, 32], strides = [1, 1]} : vector<8x32xf32> to vector<4x32xf32>
    %c0_24 = arith.constant 0 : index
    %c0_25 = arith.constant 0 : index
    %c3 = arith.constant 3 : index
    %c0_26 = arith.constant 0 : index
    %50 = vector.load %arg5[%c0_24, %c0_25, %c3, %c0_26] : memref<1x4x32x32xf32, #tpu.memory_space<vmem>>, vector<1x4x1x32xf32>
    %51 = vector.shape_cast %50 : vector<1x4x1x32xf32> to vector<4x32xf32>
    %52 = vector.shape_cast %49 : vector<4x32xf32> to vector<1x4x1x32xf32>
    tpu.vector_store %arg5[%c0_24, %c0_25, %c3, %c0_26], %52 {strides = array<i32>} : memref<1x4x32x32xf32, #tpu.memory_space<vmem>>, vector<1x4x1x32xf32>,
    %53 = vector.extract_strided_slice %12 {offsets = [0, 32], sizes = [8, 16], strides = [1, 1]} : vector<16x256xf32> to vector<8x16xf32>
    %54 = vector.extract_strided_slice %12 {offsets = [8, 32], sizes = [8, 16], strides = [1, 1]} : vector<16x256xf32> to vector<8x16xf32>
    %cst_27 = arith.constant dense<0.000000e+00> : vector<8x32xf32>
    %55 = tpu.matmul %53, %19, %cst_27 {dimension_numbers = #tpu.dot_dimension_numbers<[1], [0], [0], [1], [0, 0, 1, 1], [], []>} : vector<8x16xf32>, vector<16x32xf32>, vector<8x32xf32> -> vector<8x32xf32>
    %cst_28 = arith.constant dense<0.000000e+00> : vector<8x32xf32>
    %56 = tpu.matmul %54, %26, %cst_28 {dimension_numbers = #tpu.dot_dimension_numbers<[1], [0], [0], [1], [0, 0, 1, 1], [], []>} : vector<8x16xf32>, vector<16x32xf32>, vector<8x32xf32> -> vector<8x32xf32>
    %57 = arith.addf %55, %56 : vector<8x32xf32>
    %58 = vector.extract_strided_slice %57 {offsets = [0, 0], sizes = [4, 32], strides = [1, 1]} : vector<8x32xf32> to vector<4x32xf32>
    %c0_29 = arith.constant 0 : index
    %c0_30 = arith.constant 0 : index
    %c4 = arith.constant 4 : index
    %c0_31 = arith.constant 0 : index
    %59 = vector.load %arg5[%c0_29, %c0_30, %c4, %c0_31] : memref<1x4x32x32xf32, #tpu.memory_space<vmem>>, vector<1x4x1x32xf32>
    %60 = vector.shape_cast %59 : vector<1x4x1x32xf32> to vector<4x32xf32>
    %61 = vector.shape_cast %58 : vector<4x32xf32> to vector<1x4x1x32xf32>
    tpu.vector_store %arg5[%c0_29, %c0_30, %c4, %c0_31], %61 {strides = array<i32>} : memref<1x4x32x32xf32, #tpu.memory_space<vmem>>, vector<1x4x1x32xf32>,
    %62 = vector.extract_strided_slice %57 {offsets = [4, 0], sizes = [4, 32], strides = [1, 1]} : vector<8x32xf32> to vector<4x32xf32>
    %c0_32 = arith.constant 0 : index
    %c0_33 = arith.constant 0 : index
    %c5 = arith.constant 5 : index
    %c0_34 = arith.constant 0 : index
    %63 = vector.load %arg5[%c0_32, %c0_33, %c5, %c0_34] : memref<1x4x32x32xf32, #tpu.memory_space<vmem>>, vector<1x4x1x32xf32>
    %64 = vector.shape_cast %63 : vector<1x4x1x32xf32> to vector<4x32xf32>
    %65 = vector.shape_cast %62 : vector<4x32xf32> to vector<1x4x1x32xf32>
    tpu.vector_store %arg5[%c0_32, %c0_33, %c5, %c0_34], %65 {strides = array<i32>} : memref<1x4x32x32xf32, #tpu.memory_space<vmem>>, vector<1x4x1x32xf32>,
    %66 = vector.extract_strided_slice %12 {offsets = [0, 48], sizes = [8, 16], strides = [1, 1]} : vector<16x256xf32> to vector<8x16xf32>
    %67 = vector.extract_strided_slice %12 {offsets = [8, 48], sizes = [8, 16], strides = [1, 1]} : vector<16x256xf32> to vector<8x16xf32>
    %cst_35 = arith.constant dense<0.000000e+00> : vector<8x32xf32>
    %68 = tpu.matmul %66, %19, %cst_35 {dimension_numbers = #tpu.dot_dimension_numbers<[1], [0], [0], [1], [0, 0, 1, 1], [], []>} : vector<8x16xf32>, vector<16x32xf32>, vector<8x32xf32> -> vector<8x32xf32>
    %cst_36 = arith.constant dense<0.000000e+00> : vector<8x32xf32>
    %69 = tpu.matmul %67, %26, %cst_36 {dimension_numbers = #tpu.dot_dimension_numbers<[1], [0], [0], [1], [0, 0, 1, 1], [], []>} : vector<8x16xf32>, vector<16x32xf32>, vector<8x32xf32> -> vector<8x32xf32>
    %70 = arith.addf %68, %69 : vector<8x32xf32>
    %71 = vector.extract_strided_slice %70 {offsets = [0, 0], sizes = [4, 32], strides = [1, 1]} : vector<8x32xf32> to vector<4x32xf32>
    %c0_37 = arith.constant 0 : index
    %c0_38 = arith.constant 0 : index
    %c6 = arith.constant 6 : index
    %c0_39 = arith.constant 0 : index
    %72 = vector.load %arg5[%c0_37, %c0_38, %c6, %c0_39] : memref<1x4x32x32xf32, #tpu.memory_space<vmem>>, vector<1x4x1x32xf32>
    %73 = vector.shape_cast %72 : vector<1x4x1x32xf32> to vector<4x32xf32>
    %74 = vector.shape_cast %71 : vector<4x32xf32> to vector<1x4x1x32xf32>
    tpu.vector_store %arg5[%c0_37, %c0_38, %c6, %c0_39], %74 {strides = array<i32>} : memref<1x4x32x32xf32, #tpu.memory_space<vmem>>, vector<1x4x1x32xf32>,
    %75 = vector.extract_strided_slice %70 {offsets = [4, 0], sizes = [4, 32], strides = [1, 1]} : vector<8x32xf32> to vector<4x32xf32>
    %c0_40 = arith.constant 0 : index
    %c0_41 = arith.constant 0 : index
    %c7 = arith.constant 7 : index
    %c0_42 = arith.constant 0 : index
    %76 = vector.load %arg5[%c0_40, %c0_41, %c7, %c0_42] : memref<1x4x32x32xf32, #tpu.memory_space<vmem>>, vector<1x4x1x32xf32>
    %77 = vector.shape_cast %76 : vector<1x4x1x32xf32> to vector<4x32xf32>
    %78 = vector.shape_cast %75 : vector<4x32xf32> to vector<1x4x1x32xf32>
    tpu.vector_store %arg5[%c0_40, %c0_41, %c7, %c0_42], %78 {strides = array<i32>} : memref<1x4x32x32xf32, #tpu.memory_space<vmem>>, vector<1x4x1x32xf32>,
    %79 = vector.extract_strided_slice %12 {offsets = [0, 64], sizes = [8, 16], strides = [1, 1]} : vector<16x256xf32> to vector<8x16xf32>
    %80 = vector.extract_strided_slice %12 {offsets = [8, 64], sizes = [8, 16], strides = [1, 1]} : vector<16x256xf32> to vector<8x16xf32>
    %cst_43 = arith.constant dense<0.000000e+00> : vector<8x32xf32>
    %81 = tpu.matmul %79, %19, %cst_43 {dimension_numbers = #tpu.dot_dimension_numbers<[1], [0], [0], [1], [0, 0, 1, 1], [], []>} : vector<8x16xf32>, vector<16x32xf32>, vector<8x32xf32> -> vector<8x32xf32>
    %cst_44 = arith.constant dense<0.000000e+00> : vector<8x32xf32>
    %82 = tpu.matmul %80, %26, %cst_44 {dimension_numbers = #tpu.dot_dimension_numbers<[1], [0], [0], [1], [0, 0, 1, 1], [], []>} : vector<8x16xf32>, vector<16x32xf32>, vector<8x32xf32> -> vector<8x32xf32>
    %83 = arith.addf %81, %82 : vector<8x32xf32>
    %84 = vector.extract_strided_slice %83 {offsets = [0, 0], sizes = [4, 32], strides = [1, 1]} : vector<8x32xf32> to vector<4x32xf32>
    %c0_45 = arith.constant 0 : index
    %c0_46 = arith.constant 0 : index
    %c8 = arith.constant 8 : index
    %c0_47 = arith.constant 0 : index
    %85 = vector.load %arg5[%c0_45, %c0_46, %c8, %c0_47] : memref<1x4x32x32xf32, #tpu.memory_space<vmem>>, vector<1x4x1x32xf32>
    %86 = vector.shape_cast %85 : vector<1x4x1x32xf32> to vector<4x32xf32>
    %87 = vector.shape_cast %84 : vector<4x32xf32> to vector<1x4x1x32xf32>
    tpu.vector_store %arg5[%c0_45, %c0_46, %c8, %c0_47], %87 {strides = array<i32>} : memref<1x4x32x32xf32, #tpu.memory_space<vmem>>, vector<1x4x1x32xf32>,
    %88 = vector.extract_strided_slice %83 {offsets = [4, 0], sizes = [4, 32], strides = [1, 1]} : vector<8x32xf32> to vector<4x32xf32>
    %c0_48 = arith.constant 0 : index
    %c0_49 = arith.constant 0 : index
    %c9 = arith.constant 9 : index
    %c0_50 = arith.constant 0 : index
    %89 = vector.load %arg5[%c0_48, %c0_49, %c9, %c0_50] : memref<1x4x32x32xf32, #tpu.memory_space<vmem>>, vector<1x4x1x32xf32>
    %90 = vector.shape_cast %89 : vector<1x4x1x32xf32> to vector<4x32xf32>
    %91 = vector.shape_cast %88 : vector<4x32xf32> to vector<1x4x1x32xf32>
    tpu.vector_store %arg5[%c0_48, %c0_49, %c9, %c0_50], %91 {strides = array<i32>} : memref<1x4x32x32xf32, #tpu.memory_space<vmem>>, vector<1x4x1x32xf32>,
    %92 = vector.extract_strided_slice %12 {offsets = [0, 80], sizes = [8, 16], strides = [1, 1]} : vector<16x256xf32> to vector<8x16xf32>
    %93 = vector.extract_strided_slice %12 {offsets = [8, 80], sizes = [8, 16], strides = [1, 1]} : vector<16x256xf32> to vector<8x16xf32>
    %cst_51 = arith.constant dense<0.000000e+00> : vector<8x32xf32>
    %94 = tpu.matmul %92, %19, %cst_51 {dimension_numbers = #tpu.dot_dimension_numbers<[1], [0], [0], [1], [0, 0, 1, 1], [], []>} : vector<8x16xf32>, vector<16x32xf32>, vector<8x32xf32> -> vector<8x32xf32>
    %cst_52 = arith.constant dense<0.000000e+00> : vector<8x32xf32>
    %95 = tpu.matmul %93, %26, %cst_52 {dimension_numbers = #tpu.dot_dimension_numbers<[1], [0], [0], [1], [0, 0, 1, 1], [], []>} : vector<8x16xf32>, vector<16x32xf32>, vector<8x32xf32> -> vector<8x32xf32>
    %96 = arith.addf %94, %95 : vector<8x32xf32>
    %97 = vector.extract_strided_slice %96 {offsets = [0, 0], sizes = [4, 32], strides = [1, 1]} : vector<8x32xf32> to vector<4x32xf32>
    %c0_53 = arith.constant 0 : index
    %c0_54 = arith.constant 0 : index
    %c10 = arith.constant 10 : index
    %c0_55 = arith.constant 0 : index
    %98 = vector.load %arg5[%c0_53, %c0_54, %c10, %c0_55] : memref<1x4x32x32xf32, #tpu.memory_space<vmem>>, vector<1x4x1x32xf32>
    %99 = vector.shape_cast %98 : vector<1x4x1x32xf32> to vector<4x32xf32>
    %100 = vector.shape_cast %97 : vector<4x32xf32> to vector<1x4x1x32xf32>
    tpu.vector_store %arg5[%c0_53, %c0_54, %c10, %c0_55], %100 {strides = array<i32>} : memref<1x4x32x32xf32, #tpu.memory_space<vmem>>, vector<1x4x1x32xf32>,
    %101 = vector.extract_strided_slice %96 {offsets = [4, 0], sizes = [4, 32], strides = [1, 1]} : vector<8x32xf32> to vector<4x32xf32>
    %c0_56 = arith.constant 0 : index
    %c0_57 = arith.constant 0 : index
    %c11 = arith.constant 11 : index
    %c0_58 = arith.constant 0 : index
    %102 = vector.load %arg5[%c0_56, %c0_57, %c11, %c0_58] : memref<1x4x32x32xf32, #tpu.memory_space<vmem>>, vector<1x4x1x32xf32>
    %103 = vector.shape_cast %102 : vector<1x4x1x32xf32> to vector<4x32xf32>
    %104 = vector.shape_cast %101 : vector<4x32xf32> to vector<1x4x1x32xf32>
    tpu.vector_store %arg5[%c0_56, %c0_57, %c11, %c0_58], %104 {strides = array<i32>} : memref<1x4x32x32xf32, #tpu.memory_space<vmem>>, vector<1x4x1x32xf32>,
    %105 = vector.extract_strided_slice %12 {offsets = [0, 96], sizes = [8, 16], strides = [1, 1]} : vector<16x256xf32> to vector<8x16xf32>
    %106 = vector.extract_strided_slice %12 {offsets = [8, 96], sizes = [8, 16], strides = [1, 1]} : vector<16x256xf32> to vector<8x16xf32>
    %cst_59 = arith.constant dense<0.000000e+00> : vector<8x32xf32>
    %107 = tpu.matmul %105, %19, %cst_59 {dimension_numbers = #tpu.dot_dimension_numbers<[1], [0], [0], [1], [0, 0, 1, 1], [], []>} : vector<8x16xf32>, vector<16x32xf32>, vector<8x32xf32> -> vector<8x32xf32>
    %cst_60 = arith.constant dense<0.000000e+00> : vector<8x32xf32>
    %108 = tpu.matmul %106, %26, %cst_60 {dimension_numbers = #tpu.dot_dimension_numbers<[1], [0], [0], [1], [0, 0, 1, 1], [], []>} : vector<8x16xf32>, vector<16x32xf32>, vector<8x32xf32> -> vector<8x32xf32>
    %109 = arith.addf %107, %108 : vector<8x32xf32>
    %110 = vector.extract_strided_slice %109 {offsets = [0, 0], sizes = [4, 32], strides = [1, 1]} : vector<8x32xf32> to vector<4x32xf32>
    %c0_61 = arith.constant 0 : index
    %c0_62 = arith.constant 0 : index
    %c12 = arith.constant 12 : index
    %c0_63 = arith.constant 0 : index
    %111 = vector.load %arg5[%c0_61, %c0_62, %c12, %c0_63] : memref<1x4x32x32xf32, #tpu.memory_space<vmem>>, vector<1x4x1x32xf32>
    %112 = vector.shape_cast %111 : vector<1x4x1x32xf32> to vector<4x32xf32>
    %113 = vector.shape_cast %110 : vector<4x32xf32> to vector<1x4x1x32xf32>
    tpu.vector_store %arg5[%c0_61, %c0_62, %c12, %c0_63], %113 {strides = array<i32>} : memref<1x4x32x32xf32, #tpu.memory_space<vmem>>, vector<1x4x1x32xf32>,
    %114 = vector.extract_strided_slice %109 {offsets = [4, 0], sizes = [4, 32], strides = [1, 1]} : vector<8x32xf32> to vector<4x32xf32>
    %c0_64 = arith.constant 0 : index
    %c0_65 = arith.constant 0 : index
    %c13 = arith.constant 13 : index
    %c0_66 = arith.constant 0 : index
    %115 = vector.load %arg5[%c0_64, %c0_65, %c13, %c0_66] : memref<1x4x32x32xf32, #tpu.memory_space<vmem>>, vector<1x4x1x32xf32>
    %116 = vector.shape_cast %115 : vector<1x4x1x32xf32> to vector<4x32xf32>
    %117 = vector.shape_cast %114 : vector<4x32xf32> to vector<1x4x1x32xf32>
    tpu.vector_store %arg5[%c0_64, %c0_65, %c13, %c0_66], %117 {strides = array<i32>} : memref<1x4x32x32xf32, #tpu.memory_space<vmem>>, vector<1x4x1x32xf32>,
    %118 = vector.extract_strided_slice %12 {offsets = [0, 112], sizes = [8, 16], strides = [1, 1]} : vector<16x256xf32> to vector<8x16xf32>
    %119 = vector.extract_strided_slice %12 {offsets = [8, 112], sizes = [8, 16], strides = [1, 1]} : vector<16x256xf32> to vector<8x16xf32>
    %cst_67 = arith.constant dense<0.000000e+00> : vector<8x32xf32>
    %120 = tpu.matmul %118, %19, %cst_67 {dimension_numbers = #tpu.dot_dimension_numbers<[1], [0], [0], [1], [0, 0, 1, 1], [], []>} : vector<8x16xf32>, vector<16x32xf32>, vector<8x32xf32> -> vector<8x32xf32>
    %cst_68 = arith.constant dense<0.000000e+00> : vector<8x32xf32>
    %121 = tpu.matmul %119, %26, %cst_68 {dimension_numbers = #tpu.dot_dimension_numbers<[1], [0], [0], [1], [0, 0, 1, 1], [], []>} : vector<8x16xf32>, vector<16x32xf32>, vector<8x32xf32> -> vector<8x32xf32>
    %122 = arith.addf %120, %121 : vector<8x32xf32>
    %123 = vector.extract_strided_slice %122 {offsets = [0, 0], sizes = [4, 32], strides = [1, 1]} : vector<8x32xf32> to vector<4x32xf32>
    %c0_69 = arith.constant 0 : index
    %c0_70 = arith.constant 0 : index
    %c14 = arith.constant 14 : index
    %c0_71 = arith.constant 0 : index
    %124 = vector.load %arg5[%c0_69, %c0_70, %c14, %c0_71] : memref<1x4x32x32xf32, #tpu.memory_space<vmem>>, vector<1x4x1x32xf32>
    %125 = vector.shape_cast %124 : vector<1x4x1x32xf32> to vector<4x32xf32>
    %126 = vector.shape_cast %123 : vector<4x32xf32> to vector<1x4x1x32xf32>
    tpu.vector_store %arg5[%c0_69, %c0_70, %c14, %c0_71], %126 {strides = array<i32>} : memref<1x4x32x32xf32, #tpu.memory_space<vmem>>, vector<1x4x1x32xf32>,
    %127 = vector.extract_strided_slice %122 {offsets = [4, 0], sizes = [4, 32], strides = [1, 1]} : vector<8x32xf32> to vector<4x32xf32>
    %c0_72 = arith.constant 0 : index
    %c0_73 = arith.constant 0 : index
    %c15 = arith.constant 15 : index
    %c0_74 = arith.constant 0 : index
    %128 = vector.load %arg5[%c0_72, %c0_73, %c15, %c0_74] : memref<1x4x32x32xf32, #tpu.memory_space<vmem>>, vector<1x4x1x32xf32>
    %129 = vector.shape_cast %128 : vector<1x4x1x32xf32> to vector<4x32xf32>
    %130 = vector.shape_cast %127 : vector<4x32xf32> to vector<1x4x1x32xf32>
    tpu.vector_store %arg5[%c0_72, %c0_73, %c15, %c0_74], %130 {strides = array<i32>} : memref<1x4x32x32xf32, #tpu.memory_space<vmem>>, vector<1x4x1x32xf32>,
    %131 = vector.extract_strided_slice %12 {offsets = [0, 128], sizes = [8, 16], strides = [1, 1]} : vector<16x256xf32> to vector<8x16xf32>
    %132 = vector.extract_strided_slice %12 {offsets = [8, 128], sizes = [8, 16], strides = [1, 1]} : vector<16x256xf32> to vector<8x16xf32>
    %cst_75 = arith.constant dense<0.000000e+00> : vector<8x32xf32>
    %133 = tpu.matmul %131, %19, %cst_75 {dimension_numbers = #tpu.dot_dimension_numbers<[1], [0], [0], [1], [0, 0, 1, 1], [], []>} : vector<8x16xf32>, vector<16x32xf32>, vector<8x32xf32> -> vector<8x32xf32>
    %cst_76 = arith.constant dense<0.000000e+00> : vector<8x32xf32>
    %134 = tpu.matmul %132, %26, %cst_76 {dimension_numbers = #tpu.dot_dimension_numbers<[1], [0], [0], [1], [0, 0, 1, 1], [], []>} : vector<8x16xf32>, vector<16x32xf32>, vector<8x32xf32> -> vector<8x32xf32>
    %135 = arith.addf %133, %134 : vector<8x32xf32>
    %136 = vector.extract_strided_slice %135 {offsets = [0, 0], sizes = [4, 32], strides = [1, 1]} : vector<8x32xf32> to vector<4x32xf32>
    %c0_77 = arith.constant 0 : index
    %c0_78 = arith.constant 0 : index
    %c16 = arith.constant 16 : index
    %c0_79 = arith.constant 0 : index
    %137 = vector.load %arg5[%c0_77, %c0_78, %c16, %c0_79] : memref<1x4x32x32xf32, #tpu.memory_space<vmem>>, vector<1x4x1x32xf32>
    %138 = vector.shape_cast %137 : vector<1x4x1x32xf32> to vector<4x32xf32>
    %139 = vector.shape_cast %136 : vector<4x32xf32> to vector<1x4x1x32xf32>
    tpu.vector_store %arg5[%c0_77, %c0_78, %c16, %c0_79], %139 {strides = array<i32>} : memref<1x4x32x32xf32, #tpu.memory_space<vmem>>, vector<1x4x1x32xf32>,
    %140 = vector.extract_strided_slice %135 {offsets = [4, 0], sizes = [4, 32], strides = [1, 1]} : vector<8x32xf32> to vector<4x32xf32>
    %c0_80 = arith.constant 0 : index
    %c0_81 = arith.constant 0 : index
    %c17 = arith.constant 17 : index
    %c0_82 = arith.constant 0 : index
    %141 = vector.load %arg5[%c0_80, %c0_81, %c17, %c0_82] : memref<1x4x32x32xf32, #tpu.memory_space<vmem>>, vector<1x4x1x32xf32>
    %142 = vector.shape_cast %141 : vector<1x4x1x32xf32> to vector<4x32xf32>
    %143 = vector.shape_cast %140 : vector<4x32xf32> to vector<1x4x1x32xf32>
    tpu.vector_store %arg5[%c0_80, %c0_81, %c17, %c0_82], %143 {strides = array<i32>} : memref<1x4x32x32xf32, #tpu.memory_space<vmem>>, vector<1x4x1x32xf32>,
    %144 = vector.extract_strided_slice %12 {offsets = [0, 144], sizes = [8, 16], strides = [1, 1]} : vector<16x256xf32> to vector<8x16xf32>
    %145 = vector.extract_strided_slice %12 {offsets = [8, 144], sizes = [8, 16], strides = [1, 1]} : vector<16x256xf32> to vector<8x16xf32>
    %cst_83 = arith.constant dense<0.000000e+00> : vector<8x32xf32>
    %146 = tpu.matmul %144, %19, %cst_83 {dimension_numbers = #tpu.dot_dimension_numbers<[1], [0], [0], [1], [0, 0, 1, 1], [], []>} : vector<8x16xf32>, vector<16x32xf32>, vector<8x32xf32> -> vector<8x32xf32>
    %cst_84 = arith.constant dense<0.000000e+00> : vector<8x32xf32>
    %147 = tpu.matmul %145, %26, %cst_84 {dimension_numbers = #tpu.dot_dimension_numbers<[1], [0], [0], [1], [0, 0, 1, 1], [], []>} : vector<8x16xf32>, vector<16x32xf32>, vector<8x32xf32> -> vector<8x32xf32>
    %148 = arith.addf %146, %147 : vector<8x32xf32>
    %149 = vector.extract_strided_slice %148 {offsets = [0, 0], sizes = [4, 32], strides = [1, 1]} : vector<8x32xf32> to vector<4x32xf32>
    %c0_85 = arith.constant 0 : index
    %c0_86 = arith.constant 0 : index
    %c18 = arith.constant 18 : index
    %c0_87 = arith.constant 0 : index
    %150 = vector.load %arg5[%c0_85, %c0_86, %c18, %c0_87] : memref<1x4x32x32xf32, #tpu.memory_space<vmem>>, vector<1x4x1x32xf32>
    %151 = vector.shape_cast %150 : vector<1x4x1x32xf32> to vector<4x32xf32>
    %152 = vector.shape_cast %149 : vector<4x32xf32> to vector<1x4x1x32xf32>
    tpu.vector_store %arg5[%c0_85, %c0_86, %c18, %c0_87], %152 {strides = array<i32>} : memref<1x4x32x32xf32, #tpu.memory_space<vmem>>, vector<1x4x1x32xf32>,
    %153 = vector.extract_strided_slice %148 {offsets = [4, 0], sizes = [4, 32], strides = [1, 1]} : vector<8x32xf32> to vector<4x32xf32>
    %c0_88 = arith.constant 0 : index
    %c0_89 = arith.constant 0 : index
    %c19 = arith.constant 19 : index
    %c0_90 = arith.constant 0 : index
    %154 = vector.load %arg5[%c0_88, %c0_89, %c19, %c0_90] : memref<1x4x32x32xf32, #tpu.memory_space<vmem>>, vector<1x4x1x32xf32>
    %155 = vector.shape_cast %154 : vector<1x4x1x32xf32> to vector<4x32xf32>
    %156 = vector.shape_cast %153 : vector<4x32xf32> to vector<1x4x1x32xf32>
    tpu.vector_store %arg5[%c0_88, %c0_89, %c19, %c0_90], %156 {strides = array<i32>} : memref<1x4x32x32xf32, #tpu.memory_space<vmem>>, vector<1x4x1x32xf32>,
    %157 = vector.extract_strided_slice %12 {offsets = [0, 160], sizes = [8, 16], strides = [1, 1]} : vector<16x256xf32> to vector<8x16xf32>
    %158 = vector.extract_strided_slice %12 {offsets = [8, 160], sizes = [8, 16], strides = [1, 1]} : vector<16x256xf32> to vector<8x16xf32>
    %cst_91 = arith.constant dense<0.000000e+00> : vector<8x32xf32>
    %159 = tpu.matmul %157, %19, %cst_91 {dimension_numbers = #tpu.dot_dimension_numbers<[1], [0], [0], [1], [0, 0, 1, 1], [], []>} : vector<8x16xf32>, vector<16x32xf32>, vector<8x32xf32> -> vector<8x32xf32>
    %cst_92 = arith.constant dense<0.000000e+00> : vector<8x32xf32>
    %160 = tpu.matmul %158, %26, %cst_92 {dimension_numbers = #tpu.dot_dimension_numbers<[1], [0], [0], [1], [0, 0, 1, 1], [], []>} : vector<8x16xf32>, vector<16x32xf32>, vector<8x32xf32> -> vector<8x32xf32>
    %161 = arith.addf %159, %160 : vector<8x32xf32>
    %162 = vector.extract_strided_slice %161 {offsets = [0, 0], sizes = [4, 32], strides = [1, 1]} : vector<8x32xf32> to vector<4x32xf32>
    %c0_93 = arith.constant 0 : index
    %c0_94 = arith.constant 0 : index
    %c20 = arith.constant 20 : index
    %c0_95 = arith.constant 0 : index
    %163 = vector.load %arg5[%c0_93, %c0_94, %c20, %c0_95] : memref<1x4x32x32xf32, #tpu.memory_space<vmem>>, vector<1x4x1x32xf32>
    %164 = vector.shape_cast %163 : vector<1x4x1x32xf32> to vector<4x32xf32>
    %165 = vector.shape_cast %162 : vector<4x32xf32> to vector<1x4x1x32xf32>
    tpu.vector_store %arg5[%c0_93, %c0_94, %c20, %c0_95], %165 {strides = array<i32>} : memref<1x4x32x32xf32, #tpu.memory_space<vmem>>, vector<1x4x1x32xf32>,
    %166 = vector.extract_strided_slice %161 {offsets = [4, 0], sizes = [4, 32], strides = [1, 1]} : vector<8x32xf32> to vector<4x32xf32>
    %c0_96 = arith.constant 0 : index
    %c0_97 = arith.constant 0 : index
    %c21 = arith.constant 21 : index
    %c0_98 = arith.constant 0 : index
    %167 = vector.load %arg5[%c0_96, %c0_97, %c21, %c0_98] : memref<1x4x32x32xf32, #tpu.memory_space<vmem>>, vector<1x4x1x32xf32>
    %168 = vector.shape_cast %167 : vector<1x4x1x32xf32> to vector<4x32xf32>
    %169 = vector.shape_cast %166 : vector<4x32xf32> to vector<1x4x1x32xf32>
    tpu.vector_store %arg5[%c0_96, %c0_97, %c21, %c0_98], %169 {strides = array<i32>} : memref<1x4x32x32xf32, #tpu.memory_space<vmem>>, vector<1x4x1x32xf32>,
    %170 = vector.extract_strided_slice %12 {offsets = [0, 176], sizes = [8, 16], strides = [1, 1]} : vector<16x256xf32> to vector<8x16xf32>
    %171 = vector.extract_strided_slice %12 {offsets = [8, 176], sizes = [8, 16], strides = [1, 1]} : vector<16x256xf32> to vector<8x16xf32>
    %cst_99 = arith.constant dense<0.000000e+00> : vector<8x32xf32>
    %172 = tpu.matmul %170, %19, %cst_99 {dimension_numbers = #tpu.dot_dimension_numbers<[1], [0], [0], [1], [0, 0, 1, 1], [], []>} : vector<8x16xf32>, vector<16x32xf32>, vector<8x32xf32> -> vector<8x32xf32>
    %cst_100 = arith.constant dense<0.000000e+00> : vector<8x32xf32>
    %173 = tpu.matmul %171, %26, %cst_100 {dimension_numbers = #tpu.dot_dimension_numbers<[1], [0], [0], [1], [0, 0, 1, 1], [], []>} : vector<8x16xf32>, vector<16x32xf32>, vector<8x32xf32> -> vector<8x32xf32>
    %174 = arith.addf %172, %173 : vector<8x32xf32>
    %175 = vector.extract_strided_slice %174 {offsets = [0, 0], sizes = [4, 32], strides = [1, 1]} : vector<8x32xf32> to vector<4x32xf32>
    %c0_101 = arith.constant 0 : index
    %c0_102 = arith.constant 0 : index
    %c22 = arith.constant 22 : index
    %c0_103 = arith.constant 0 : index
    %176 = vector.load %arg5[%c0_101, %c0_102, %c22, %c0_103] : memref<1x4x32x32xf32, #tpu.memory_space<vmem>>, vector<1x4x1x32xf32>
    %177 = vector.shape_cast %176 : vector<1x4x1x32xf32> to vector<4x32xf32>
    %178 = vector.shape_cast %175 : vector<4x32xf32> to vector<1x4x1x32xf32>
    tpu.vector_store %arg5[%c0_101, %c0_102, %c22, %c0_103], %178 {strides = array<i32>} : memref<1x4x32x32xf32, #tpu.memory_space<vmem>>, vector<1x4x1x32xf32>,
    %179 = vector.extract_strided_slice %174 {offsets = [4, 0], sizes = [4, 32], strides = [1, 1]} : vector<8x32xf32> to vector<4x32xf32>
    %c0_104 = arith.constant 0 : index
    %c0_105 = arith.constant 0 : index
    %c23 = arith.constant 23 : index
    %c0_106 = arith.constant 0 : index
    %180 = vector.load %arg5[%c0_104, %c0_105, %c23, %c0_106] : memref<1x4x32x32xf32, #tpu.memory_space<vmem>>, vector<1x4x1x32xf32>
    %181 = vector.shape_cast %180 : vector<1x4x1x32xf32> to vector<4x32xf32>
    %182 = vector.shape_cast %179 : vector<4x32xf32> to vector<1x4x1x32xf32>
    tpu.vector_store %arg5[%c0_104, %c0_105, %c23, %c0_106], %182 {strides = array<i32>} : memref<1x4x32x32xf32, #tpu.memory_space<vmem>>, vector<1x4x1x32xf32>,
    %183 = vector.extract_strided_slice %12 {offsets = [0, 192], sizes = [8, 16], strides = [1, 1]} : vector<16x256xf32> to vector<8x16xf32>
    %184 = vector.extract_strided_slice %12 {offsets = [8, 192], sizes = [8, 16], strides = [1, 1]} : vector<16x256xf32> to vector<8x16xf32>
    %cst_107 = arith.constant dense<0.000000e+00> : vector<8x32xf32>
    %185 = tpu.matmul %183, %19, %cst_107 {dimension_numbers = #tpu.dot_dimension_numbers<[1], [0], [0], [1], [0, 0, 1, 1], [], []>} : vector<8x16xf32>, vector<16x32xf32>, vector<8x32xf32> -> vector<8x32xf32>
    %cst_108 = arith.constant dense<0.000000e+00> : vector<8x32xf32>
    %186 = tpu.matmul %184, %26, %cst_108 {dimension_numbers = #tpu.dot_dimension_numbers<[1], [0], [0], [1], [0, 0, 1, 1], [], []>} : vector<8x16xf32>, vector<16x32xf32>, vector<8x32xf32> -> vector<8x32xf32>
    %187 = arith.addf %185, %186 : vector<8x32xf32>
    %188 = vector.extract_strided_slice %187 {offsets = [0, 0], sizes = [4, 32], strides = [1, 1]} : vector<8x32xf32> to vector<4x32xf32>
    %c0_109 = arith.constant 0 : index
    %c0_110 = arith.constant 0 : index
    %c24 = arith.constant 24 : index
    %c0_111 = arith.constant 0 : index
    %189 = vector.load %arg5[%c0_109, %c0_110, %c24, %c0_111] : memref<1x4x32x32xf32, #tpu.memory_space<vmem>>, vector<1x4x1x32xf32>
    %190 = vector.shape_cast %189 : vector<1x4x1x32xf32> to vector<4x32xf32>
    %191 = vector.shape_cast %188 : vector<4x32xf32> to vector<1x4x1x32xf32>
    tpu.vector_store %arg5[%c0_109, %c0_110, %c24, %c0_111], %191 {strides = array<i32>} : memref<1x4x32x32xf32, #tpu.memory_space<vmem>>, vector<1x4x1x32xf32>,
    %192 = vector.extract_strided_slice %187 {offsets = [4, 0], sizes = [4, 32], strides = [1, 1]} : vector<8x32xf32> to vector<4x32xf32>
    %c0_112 = arith.constant 0 : index
    %c0_113 = arith.constant 0 : index
    %c25 = arith.constant 25 : index
    %c0_114 = arith.constant 0 : index
    %193 = vector.load %arg5[%c0_112, %c0_113, %c25, %c0_114] : memref<1x4x32x32xf32, #tpu.memory_space<vmem>>, vector<1x4x1x32xf32>
    %194 = vector.shape_cast %193 : vector<1x4x1x32xf32> to vector<4x32xf32>
    %195 = vector.shape_cast %192 : vector<4x32xf32> to vector<1x4x1x32xf32>
    tpu.vector_store %arg5[%c0_112, %c0_113, %c25, %c0_114], %195 {strides = array<i32>} : memref<1x4x32x32xf32, #tpu.memory_space<vmem>>, vector<1x4x1x32xf32>,
    %196 = vector.extract_strided_slice %12 {offsets = [0, 208], sizes = [8, 16], strides = [1, 1]} : vector<16x256xf32> to vector<8x16xf32>
    %197 = vector.extract_strided_slice %12 {offsets = [8, 208], sizes = [8, 16], strides = [1, 1]} : vector<16x256xf32> to vector<8x16xf32>
    %cst_115 = arith.constant dense<0.000000e+00> : vector<8x32xf32>
    %198 = tpu.matmul %196, %19, %cst_115 {dimension_numbers = #tpu.dot_dimension_numbers<[1], [0], [0], [1], [0, 0, 1, 1], [], []>} : vector<8x16xf32>, vector<16x32xf32>, vector<8x32xf32> -> vector<8x32xf32>
    %cst_116 = arith.constant dense<0.000000e+00> : vector<8x32xf32>
    %199 = tpu.matmul %197, %26, %cst_116 {dimension_numbers = #tpu.dot_dimension_numbers<[1], [0], [0], [1], [0, 0, 1, 1], [], []>} : vector<8x16xf32>, vector<16x32xf32>, vector<8x32xf32> -> vector<8x32xf32>
    %200 = arith.addf %198, %199 : vector<8x32xf32>
    %201 = vector.extract_strided_slice %200 {offsets = [0, 0], sizes = [4, 32], strides = [1, 1]} : vector<8x32xf32> to vector<4x32xf32>
    %c0_117 = arith.constant 0 : index
    %c0_118 = arith.constant 0 : index
    %c26 = arith.constant 26 : index
    %c0_119 = arith.constant 0 : index
    %202 = vector.load %arg5[%c0_117, %c0_118, %c26, %c0_119] : memref<1x4x32x32xf32, #tpu.memory_space<vmem>>, vector<1x4x1x32xf32>
    %203 = vector.shape_cast %202 : vector<1x4x1x32xf32> to vector<4x32xf32>
    %204 = vector.shape_cast %201 : vector<4x32xf32> to vector<1x4x1x32xf32>
    tpu.vector_store %arg5[%c0_117, %c0_118, %c26, %c0_119], %204 {strides = array<i32>} : memref<1x4x32x32xf32, #tpu.memory_space<vmem>>, vector<1x4x1x32xf32>,
    %205 = vector.extract_strided_slice %200 {offsets = [4, 0], sizes = [4, 32], strides = [1, 1]} : vector<8x32xf32> to vector<4x32xf32>
    %c0_120 = arith.constant 0 : index
    %c0_121 = arith.constant 0 : index
    %c27 = arith.constant 27 : index
    %c0_122 = arith.constant 0 : index
    %206 = vector.load %arg5[%c0_120, %c0_121, %c27, %c0_122] : memref<1x4x32x32xf32, #tpu.memory_space<vmem>>, vector<1x4x1x32xf32>
    %207 = vector.shape_cast %206 : vector<1x4x1x32xf32> to vector<4x32xf32>
    %208 = vector.shape_cast %205 : vector<4x32xf32> to vector<1x4x1x32xf32>
    tpu.vector_store %arg5[%c0_120, %c0_121, %c27, %c0_122], %208 {strides = array<i32>} : memref<1x4x32x32xf32, #tpu.memory_space<vmem>>, vector<1x4x1x32xf32>,
    %209 = vector.extract_strided_slice %12 {offsets = [0, 224], sizes = [8, 16], strides = [1, 1]} : vector<16x256xf32> to vector<8x16xf32>
    %210 = vector.extract_strided_slice %12 {offsets = [8, 224], sizes = [8, 16], strides = [1, 1]} : vector<16x256xf32> to vector<8x16xf32>
    %cst_123 = arith.constant dense<0.000000e+00> : vector<8x32xf32>
    %211 = tpu.matmul %209, %19, %cst_123 {dimension_numbers = #tpu.dot_dimension_numbers<[1], [0], [0], [1], [0, 0, 1, 1], [], []>} : vector<8x16xf32>, vector<16x32xf32>, vector<8x32xf32> -> vector<8x32xf32>
    %cst_124 = arith.constant dense<0.000000e+00> : vector<8x32xf32>
    %212 = tpu.matmul %210, %26, %cst_124 {dimension_numbers = #tpu.dot_dimension_numbers<[1], [0], [0], [1], [0, 0, 1, 1], [], []>} : vector<8x16xf32>, vector<16x32xf32>, vector<8x32xf32> -> vector<8x32xf32>
    %213 = arith.addf %211, %212 : vector<8x32xf32>
    %214 = vector.extract_strided_slice %213 {offsets = [0, 0], sizes = [4, 32], strides = [1, 1]} : vector<8x32xf32> to vector<4x32xf32>
    %c0_125 = arith.constant 0 : index
    %c0_126 = arith.constant 0 : index
    %c28 = arith.constant 28 : index
    %c0_127 = arith.constant 0 : index
    %215 = vector.load %arg5[%c0_125, %c0_126, %c28, %c0_127] : memref<1x4x32x32xf32, #tpu.memory_space<vmem>>, vector<1x4x1x32xf32>
    %216 = vector.shape_cast %215 : vector<1x4x1x32xf32> to vector<4x32xf32>
    %217 = vector.shape_cast %214 : vector<4x32xf32> to vector<1x4x1x32xf32>
    tpu.vector_store %arg5[%c0_125, %c0_126, %c28, %c0_127], %217 {strides = array<i32>} : memref<1x4x32x32xf32, #tpu.memory_space<vmem>>, vector<1x4x1x32xf32>,
    %218 = vector.extract_strided_slice %213 {offsets = [4, 0], sizes = [4, 32], strides = [1, 1]} : vector<8x32xf32> to vector<4x32xf32>
    %c0_128 = arith.constant 0 : index
    %c0_129 = arith.constant 0 : index
    %c29 = arith.constant 29 : index
    %c0_130 = arith.constant 0 : index
    %219 = vector.load %arg5[%c0_128, %c0_129, %c29, %c0_130] : memref<1x4x32x32xf32, #tpu.memory_space<vmem>>, vector<1x4x1x32xf32>
    %220 = vector.shape_cast %219 : vector<1x4x1x32xf32> to vector<4x32xf32>
    %221 = vector.shape_cast %218 : vector<4x32xf32> to vector<1x4x1x32xf32>
    tpu.vector_store %arg5[%c0_128, %c0_129, %c29, %c0_130], %221 {strides = array<i32>} : memref<1x4x32x32xf32, #tpu.memory_space<vmem>>, vector<1x4x1x32xf32>,
    %222 = vector.extract_strided_slice %12 {offsets = [0, 240], sizes = [8, 16], strides = [1, 1]} : vector<16x256xf32> to vector<8x16xf32>
    %223 = vector.extract_strided_slice %12 {offsets = [8, 240], sizes = [8, 16], strides = [1, 1]} : vector<16x256xf32> to vector<8x16xf32>
    %cst_131 = arith.constant dense<0.000000e+00> : vector<8x32xf32>
    %224 = tpu.matmul %222, %19, %cst_131 {dimension_numbers = #tpu.dot_dimension_numbers<[1], [0], [0], [1], [0, 0, 1, 1], [], []>} : vector<8x16xf32>, vector<16x32xf32>, vector<8x32xf32> -> vector<8x32xf32>
    %cst_132 = arith.constant dense<0.000000e+00> : vector<8x32xf32>
    %225 = tpu.matmul %223, %26, %cst_132 {dimension_numbers = #tpu.dot_dimension_numbers<[1], [0], [0], [1], [0, 0, 1, 1], [], []>} : vector<8x16xf32>, vector<16x32xf32>, vector<8x32xf32> -> vector<8x32xf32>
    %226 = arith.addf %224, %225 : vector<8x32xf32>
    %227 = vector.extract_strided_slice %226 {offsets = [0, 0], sizes = [4, 32], strides = [1, 1]} : vector<8x32xf32> to vector<4x32xf32>
    %c0_133 = arith.constant 0 : index
    %c0_134 = arith.constant 0 : index
    %c30 = arith.constant 30 : index
    %c0_135 = arith.constant 0 : index
    %228 = vector.load %arg5[%c0_133, %c0_134, %c30, %c0_135] : memref<1x4x32x32xf32, #tpu.memory_space<vmem>>, vector<1x4x1x32xf32>
    %229 = vector.shape_cast %228 : vector<1x4x1x32xf32> to vector<4x32xf32>
    %230 = vector.shape_cast %227 : vector<4x32xf32> to vector<1x4x1x32xf32>
    tpu.vector_store %arg5[%c0_133, %c0_134, %c30, %c0_135], %230 {strides = array<i32>} : memref<1x4x32x32xf32, #tpu.memory_space<vmem>>, vector<1x4x1x32xf32>,
    %231 = vector.extract_strided_slice %226 {offsets = [4, 0], sizes = [4, 32], strides = [1, 1]} : vector<8x32xf32> to vector<4x32xf32>
    %c0_136 = arith.constant 0 : index
    %c0_137 = arith.constant 0 : index
    %c31 = arith.constant 31 : index
    %c0_138 = arith.constant 0 : index
    %232 = vector.load %arg5[%c0_136, %c0_137, %c31, %c0_138] : memref<1x4x32x32xf32, #tpu.memory_space<vmem>>, vector<1x4x1x32xf32>
    %233 = vector.shape_cast %232 : vector<1x4x1x32xf32> to vector<4x32xf32>
    %234 = vector.shape_cast %231 : vector<4x32xf32> to vector<1x4x1x32xf32>
    tpu.vector_store %arg5[%c0_136, %c0_137, %c31, %c0_138], %234 {strides = array<i32>} : memref<1x4x32x32xf32, #tpu.memory_space<vmem>>, vector<1x4x1x32xf32>,
    return
  }
  func.func @transform_0(%arg0: i32, %arg1: i32) -> (i32, i32, i32) {
    %c0_i32 = arith.constant 0 : i32
    %c0_i32_0 = arith.constant 0 : i32
    return %arg0, %c0_i32, %arg1 : i32, i32, i32
  }
  func.func @transform_1(%arg0: i32, %arg1: i32) -> (i32, i32) {
    %c0_i32 = arith.constant 0 : i32
    %c0_i32_0 = arith.constant 0 : i32
    %c0_i32_1 = arith.constant 0 : i32
    return %c0_i32, %c0_i32_0 : i32, i32
  }
  func.func @transform_2(%arg0: i32, %arg1: i32) -> (i32, i32) {
    %c0_i32 = arith.constant 0 : i32
    %c0_i32_0 = arith.constant 0 : i32
    %c0_i32_1 = arith.constant 0 : i32
    return %c0_i32, %c0_i32_0 : i32, i32
  }
  func.func @transform_3(%arg0: i32, %arg1: i32) -> (i32, i32, i32, i32) {
    %c0_i32 = arith.constant 0 : i32
    %c0_i32_0 = arith.constant 0 : i32
    %c0_i32_1 = arith.constant 0 : i32
    return %arg0, %c0_i32, %arg1, %c0_i32_0 : i32, i32, i32, i32
  }
}

</mosaic_0001>

<bundles_post_ra>
// kernel: tile.17
= control target key start
LH: loop header
LB: loop body
LE: loop exit
PB: predicated region body
PF: predicated region fallthrough
CT: control target
= control target key end

     0   :  { %s22_s0 = inlined_call_operand.vmem [shape: f32[4], index: 0, kind: input, shape index: {}]   ;;  %s23_s1 = inlined_call_operand.vmem [shape: f32[4,4], index: 1, kind: output, shape index: {}]  }
   0x1   :  { %v4_v0 = vld [vmem:[%s22_s0] ss:$0 sm:$0xff] }
   0x2   :  { %5 = vst [vmem:[%s23_s1] sm:$0xf] %v4_v0 }

// kernel: tile.19
= control target key start
LH: loop header
LB: loop body
LE: loop exit
PB: predicated region body
PF: predicated region fallthrough
CT: control target
= control target key end

     0   :  { %vm8_vm0 = vcmask 31744   ;;  %s40_s8 = smov 4   ;;  %s41_s9 = smov 8   ;;  %vm14_vm1 = vcmask 130144   ;;  %vm20_vm2 = vcmask 97344   ;;  %vm26_vm3 = vcmask 64544   ;;  %s58_s0 = inlined_call_operand.vmem [shape: f32[4,4], index: 0, kind: input, shape index: {}]   ;;  %s59_s1 = inlined_call_operand.vmem [shape: f32[16,1], index: 1, kind: output, shape index: {}]  }
   0x1   :  { %v5_v0 = vld [vmem:[%s58_s0] sm:$0xf]  ;;  %s39_s0 = smov 12  }
   0x2   :  { %6 = vst [vmem:[#allocation1] sm:$0xf] %v5_v0 }
   0x9   :  { %v11_v1 = vld [vmem:[#allocation1 + $0x3] sm:$0x1]   ;;  %v23_v2 = vld [vmem:[#allocation1 + $0x1] sm:$0x1]   ;;  %v7_v3 = vld [vmem:[#allocation1] sm:$0x1]  }
   0xa   :  { %12 = vrot.lane.b32.xlu0 %v11_v1, %s39_s0  ;;  %24 = vrot.lane.b32.xlu1 %v23_v2, %s40_s8  ;;  %v17_v4 = vld [vmem:[#allocation1 + $0x2] sm:$0x1]   ;;  %9 = vst.msk [vmem:[#allocation0] sm:$0x1] %vm8_vm0, %v7_v3  }
   0xe   :  { %18 = vrot.lane.b32.xlu0 %v17_v4, %s41_s9 }
  0x7c   :  { %v13_v5 = vpop.permute.xlu0 %12   ;;  %v25_v6 = vpop.permute.xlu1 %24  }
  0x7d   :  { %15 = vst.msk [vmem:[#allocation0] sm:$0x1] %vm14_vm1, %v13_v5  }
  0x80   :  { %v19_v7 = vpop.permute.xlu0 %18  }
  0x81   :  { %21 = vst.msk [vmem:[#allocation0] sm:$0x1] %vm20_vm2, %v19_v7  }
  0x82   :  { %27 = vst.msk [vmem:[#allocation0] sm:$0x1] %vm26_vm3, %v25_v6  }
  0x89   :  { %v32_v8 = vld [vmem:[#allocation0] sm:$0x1] }
  0x8a   :  { %35 = vst [vmem:[%s59_s1] sm:$0x1] %v32_v8 }

// kernel: up_forward.2
= control target key start
LH: loop header
LB: loop body
LE: loop exit
PB: predicated region body
PF: predicated region fallthrough
CT: control target
= control target key end

     0   :  { %s465_s9 = smov 0   ;;  %s467_s10 = smov 0   ;;  %s505_s0 = inlined_call_operand.vmem [shape: f32[2,60,256], index: 0, kind: input, shape index: {}]   ;;  %s506_s1 = inlined_call_operand.vmem [shape: bf16[16,60], index: 1, kind: input, shape index: {}]   ;;  %s507_s2 = inlined_call_operand.vmem [shape: f32[2,1,4,2], index: 2, kind: output, shape index: {}]  }
   0x1   :  { %s469_s11 = smov 0  }
   0x2 LB: > { %s24_s12 = sadd.s32 1, %s442_s10  ;;  %p387_p0 = scmp.ge.s32.totalorder %s446_s11, 1  ;;  %s446_s11 = sphi %s469_s11, %s12_s11   ;;  %s442_s10 = sphi %s467_s10, %s509_s10   ;;  %s438_s9 = sphi %s465_s9, %s508_s9  }
   0x3   : > { %p26_p1 = scmp.ge.s32.totalorder %s24_s12, 2  ;;  %p133_p2 = scmp.lt.s32.totalorder %s446_s11, 3 }
   0x5   : > { %s511_s12 = smov (%p26_p1, %s24_s12), 0  ;;  %p134_p3 = pnand %p387_p0, %p133_p2 }
   0x6   : > { %p162_p4 = scmp.lt.s32.totalorder (!%p134_p3), %s438_s9, 1  ;;  %s449_s19 = smov (!%p134_p3), 1  }
   0x7   : > { %137 = sbr.rel (%p134_p3) target bundleno = 497 (0x1f1), region = 28 }
   0xc   : > { %v448_v0 = vmov 0   ;;  %s513_s9 = smov (!%p162_p4, %s438_s9), 1  ;;  %vm214_vm0 = vcmask 1045504   ;;  %v423_v26 = vld [vmem:[%s506_s1] sm:$0xff]   ;;  %vm210_vm1 = vcmask 490496   ;;  %vm302_vm2 = vcmask 7168  }
   0xd   : > { %253 = vmatprep.mubr.bf16.mxu0 %v448_v0  ;;  %s396_s13 = sshll.u32 %s513_s9, 7  ;;  %s390_s20 = sshll.u32 %s513_s9, 2  ;;  %vm304_vm3 = vcmask 11264  }
   0xe   : > { %s169_s16 = scalar_lea.vmem %s505_s0, %s396_s13  ;;  %s177_s23 = scalar_lea.vmem %s507_s2, %s390_s20 }
   0xf   : > { %v192_v1 = vld [vmem:[%s169_s16 + $0x68] sm:$0xff]  ;;  %v194_v2 = vld [vmem:[%s169_s16 + $0x78] sm:$0xf]  ;;  %v191_v3 = vld [vmem:[%s169_s16 + $0x60] sm:$0xff] }
  0x10   : > { %v202_v4 = vpack.c.bf16 %v194_v2, %v192_v1  ;;  %v193_v5 = vld [vmem:[%s169_s16 + $0x70] sm:$0xf]  ;;  %v188_v6 = vld [vmem:[%s169_s16 + $0x48] sm:$0xff]  ;;  %v190_v7 = vld [vmem:[%s169_s16 + $0x58] sm:$0xff] }
  0x11   : > { %v201_v8 = vpack.c.bf16 %v193_v5, %v191_v3  ;;  %v200_v9 = vpack.c.bf16 %v190_v7, %v188_v6  ;;  %v187_v10 = vld [vmem:[%s169_s16 + $0x40] sm:$0xff]  ;;  %v189_v11 = vld [vmem:[%s169_s16 + $0x50] sm:$0xff]  ;;  %v184_v12 = vld [vmem:[%s169_s16 + $0x28] sm:$0xff] }
  0x12   : > { %392 = vmatprep.subr.msk.bf16.mxu0 %vm214_vm0, %v202_v4  ;;  %v186_v13 = vld [vmem:[%s169_s16 + $0x38] sm:$0xff]  ;;  %v199_v15 = vpack.c.bf16 %v189_v11, %v187_v10  ;;  %v183_v17 = vld [vmem:[%s169_s16 + $0x20] sm:$0xff]  ;;  %v185_v18 = vld [vmem:[%s169_s16 + $0x30] sm:$0xff] }
  0x13   : > { %v216_v14 = vsel %vm214_vm0, %v201_v8, 0  ;;  %v198_v16 = vpack.c.bf16 %v186_v13, %v184_v12  ;;  %v180_v19 = vld [vmem:[%s169_s16 + $0x8] sm:$0xff]  ;;  %v182_v20 = vld [vmem:[%s169_s16 + $0x18] sm:$0xff]  ;;  %v197_v21 = vpack.c.bf16 %v185_v18, %v183_v17  ;;  %v179_v23 = vld [vmem:[%s169_s16] sm:$0xff] }
  0x14   : > { %230 = vmatpush1.bf16.msra.mxu0 %v216_v14  ;;  %v196_v22 = vpack.c.bf16 %v182_v20, %v180_v19  ;;  %v181_v24 = vld [vmem:[%s169_s16 + $0x10] sm:$0xff] }
  0x15   : > { %231 = vmatprep.subr.bf16.mxu0 %v200_v9  ;;  %v195_v25 = vpack.c.bf16 %v181_v24, %v179_v23 }
  0x18   : > { %232 = vmatpush1.bf16.msra.mxu0 %v199_v15 }
  0x19   : > { %233 = vmatprep.subr.bf16.mxu0 %v198_v16 }
  0x1c   : > { %234 = vmatpush1.bf16.msra.mxu0 %v197_v21 }
  0x1d   : > { %235 = vmatprep.subr.bf16.mxu0 %v196_v22 }
  0x20   : > { %236 = vmatpush1.bf16.msra.mxu0 %v195_v25 }
  0x23   : > { %393 = vmatmul.mubr.msk.bf16.vlgmr.msra.gmra.mxu0 %vm210_vm1, %v423_v26 }
  0xe3   : > { %v255_v27 = vpop.f32.mrf.mxu0 }
  0xe4   : > { %v270_v29 = vmul.f32 %v255_v27, %v255_v27 }
  0xe5   : > { %v257_v28 = vpop.f32.mrf.mxu0 }
  0xe6   : > { %v271_v30 = vmul.f32 %v257_v28, %v257_v28  ;;  %v264_v31 = vadd.f32 %v257_v28, %v255_v27 }
  0xe7   : > { %v259_v32 = vpop.f32.mrf.mxu0 }
  0xe8   : > { %265 = vadd.xlane.f32.xlu1 %v264_v31  ;;  %v274_v33 = vadd.f32 %v271_v30, %v270_v29  ;;  %v272_v35 = vmul.f32 %v259_v32, %v259_v32 }
  0xe9   : > { %v261_v34 = vpop.f32.mrf.mxu0 }
  0xea   : > { %v267_v36 = vadd.f32 %v261_v34, %v259_v32  ;;  %v273_v37 = vmul.f32 %v261_v34, %v261_v34  ;;  %275 = vadd.xlane.f32.xlu0 %v274_v33 }
  0xec   : > { %268 = vadd.xlane.f32.xlu1 %v267_v36  ;;  %v277_v38 = vadd.f32 %v273_v37, %v272_v35 }
  0xee   : > { %278 = vadd.xlane.f32.xlu0 %v277_v38 }
 0x171   : > { %v266_v46 = vpop.xlane.xlu1 %265 }
 0x172   : > { %v281_v47 = vrot.slane %v266_v46, 4 }
 0x173   : > { %v276_v39 = vpop.xlane.xlu0 %275 }
 0x174   : > { %v290_v40 = vrot.slane %v276_v39, 4  ;;  %v283_v48 = vadd.f32 %v281_v47, %v266_v46 }
 0x175   : > { %v269_v49 = vpop.xlane.xlu1 %268 }
 0x176   : > { %v292_v41 = vadd.f32 %v290_v40, %v276_v39  ;;  %v284_v50 = vadd.f32 %v283_v48, %v269_v49  ;;  %v286_v51 = vrot.slane %v269_v49, 4 }
 0x177   : > { %v279_v42 = vpop.xlane.xlu0 %278 }
 0x178   : > { %v293_v43 = vadd.f32 %v292_v41, %v279_v42  ;;  %v295_v44 = vrot.slane %v279_v42, 4  ;;  %v288_v52 = vadd.f32 %v286_v51, %v284_v50 }
 0x17a   : > { %v297_v45 = vadd.f32 %v295_v44, %v293_v43 }
 0x17c   : > { %299 = vrot.lane.b32.xlu0 %v297_v45, %s449_s19 }
 0x1ee   : > { %v300_v53 = vpop.permute.xlu0 %299 }
 0x1ef   : > { %v303_v54 = vsel %vm302_vm2, %v288_v52, %v300_v53 }
 0x1f0   : > { %305 = vst.msk [vmem:[%s177_s23] sm:$0xf] %vm304_vm3, %v303_v54 }
 0x1f1 PF: > { %s12_s11 = sadd.s32 1, %s446_s11   ;;  %s508_s9 = smov %s442_s10 }
 0x1f2   : > { %p9_p5 = scmp.ge.s32.totalorder %s12_s11, 4   ;;  %s509_s10 = smov %s511_s12 }
 0x1f4   :  { %11 = sbr.rel (!%p9_p5) target bundleno = 2 (0x2), region = 58 }

// kernel: up_forward.3
= control target key start
LH: loop header
LB: loop body
LE: loop exit
PB: predicated region body
PF: predicated region fallthrough
CT: control target
= control target key end

     0   :  { %8 = vsyncpa [#allocation3], 0  ;;  %s5396_s0 = inlined_call_operand.vmem [shape: f32[2,60,256], index: 0, kind: input, shape index: {}]   ;;  %s5397_s1 = inlined_call_operand.vmem [shape: bf16[16,60], index: 1, kind: input, shape index: {}]   ;;  %s5398_s2 = inlined_call_operand.vmem [shape: f32[16,2], index: 2, kind: input, shape index: {}]   ;;  %s5399_s3 = inlined_call_operand.hbm [shape: f32[2,4,32,32], index: 3, kind: output, shape index: {}]  }
   0x1   :  { %10 = vsyncpa [#allocation3 + $0x1], 0  ;;  %s4483_s12 = smov 0   ;;  %s4485_s13 = smov 0  }
   0x2   :  { %s4487_s14 = smov 0   ;;  %s4489_s15 = smov 0  }
   0x3   :  { %s4491_s16 = smov 0   ;;  %s4493_s17 = smov 0  }
   0x4 LB: > { %s3856_s18 = sadd.s32 4294967295, %s4445_s17   ;;  %s3857_s19 = sadd.s32 4294967294, %s4445_s17   ;;  %s4445_s17 = sphi %s4493_s17, %s16_s17   ;;  %s4441_s16 = sphi %s4491_s16, %s5414_s16   ;;  %s4437_s15 = sphi %s4489_s15, %s5413_s15   ;;  %s4433_s14 = sphi %s4487_s14, %s5412_s14   ;;  %s4429_s13 = sphi %s4485_s13, %s5411_s13   ;;  %s4425_s12 = sphi %s4483_s12, %s5410_s12  }
   0x5   : > { %s28_s20 = sadd.s32 1, %s4441_s16  ;;  %s107_s21 = sadd.s32 1, %s4433_s14 }
   0x6   : > { %p30_p0 = scmp.ge.s32.totalorder %s28_s20, 2  ;;  %p117_p1 = scmp.ne.s32.totalorder %s4433_s14, %s4429_s13 }
   0x7   : > { %p118_p2 = scmp.eq.s32.totalorder %s3856_s18, 1  ;;  %p123_p3 = scmp.ne.s32.totalorder %s4429_s13, %s4425_s12 }
   0x8   : > { %s5416_s20 = smov (%p30_p0, %s28_s20), 0  ;;  %p124_p5 = scmp.eq.s32.totalorder %s3857_s19, 1 }
   0x9   : > { %p4523_p4 = por %p118_p2, %p117_p1  ;;  %s102_s23 = ssub.s32 %s4441_s16, %s5416_s20 }
   0xa   : > { %p3860_p6 = scmp.ge.s32.totalorder %s4445_s17, 1  ;;  %p105_p7 = scmp.eq.s32.totalorder %s102_s23, 0 }
   0xb   : > { %p4530_p8 = por %p124_p5, %p123_p3  ;;  %p161_p9 = scmp.lt.s32.totalorder %s4445_s17, 3 }
   0xc   : > { %s4536_s25 = scalar_select %p105_p7, %s4433_s14, %s107_s21  }
   0xd   : > { %p162_p10 = pnand %p3860_p6, %p161_p9 }
   0xe   : > { %p190_p11 = scmp.lt.s32.totalorder (!%p162_p10), %s4437_s15, 1  ;;  %s4452_s10 = smov (!%p162_p10), 112  }
   0xf   : > { %165 = sbr.rel (%p162_p10) target bundleno = 667 (0x29b), region = 32  ;;  %s4453_s11 = smov (!%p162_p10), 96  }
  0x10   : > { %s4454_s18 = smov (!%p162_p10), 80   ;;  %s4455_s19 = smov (!%p162_p10), 64  }
  0x11   : > { %s4456_s21 = smov (!%p162_p10), 48   ;;  %s4457_s23 = smov (!%p162_p10), 32  }
  0x12   : > { %s4458_s26 = smov (!%p162_p10), 16   ;;  %s186_s27 = sand.u32 (!%p162_p10), 1, %s4429_s13  }
  0x13   : > { %s3861_s28 = sshll.u32 (!%p162_p10), %s186_s27, 7  ;;  %s4460_s9 = smov (!%p162_p10), [#allocation2]  }
  0x14   : > { %v4447_v0 = vmov 0   ;;  %v286_v1 = vld [vmem:[%s5398_s2] sm:$0xff]  ;;  %v287_v2 = vld [vmem:[%s5398_s2 + $0x8] sm:$0xff]  ;;  %s191_s30 = scalar_select %p190_p11, %s4437_s15, 1  ;;  %vm236_vm0 = vcmask 1045504   ;;  %v4448_v6 = vmov 1   ;;  %v318_v30 = vlaneseq }
  0x15   : > { %275 = vmatprep.mubr.bf16.mxu0 %v4447_v0  ;;  %4366 = vset.pattern.permute.xlu1 %v4447_v0  ;;  %v4368_v29 = vld [vmem:[%s5397_s1] sm:$0xff]   ;;  %vm232_vm1 = vcmask 490496   ;;  %v4449_v37 = vmov 0.0   ;;  %v4450_v40 = vmov 1.0   ;;  %vm4451_vm4 = vmmov 0   ;;  %s4990_s29 = scalar_lea.vmem [#allocation2], %s3861_s28 }
  0x16   : > { %290 = vperm.xlu1 %4366, %v286_v1   ;;  %4364 = vset.pattern.permute.xlu0 %v4447_v0  ;;  %s3972_s4 = sshll.u32 %s191_s30, 7  ;;  %v4572_v31 = vshrl.u32 %v318_v30, 7  ;;  %v319_v34 = vand.u32 127, %v318_v30  ;;  %vm339_vm7 = vcmask 130048   ;;  %vm515_vm8 = vcmask 253952   ;;  %s3973_s30 = sshll.u32 %s4437_s15, 11 }
  0x17   : > { %295 = vperm.xlu0 %4364, %v287_v2   ;;  %s4549_s7 = scalar_lea.vmem %s5396_s0, %s3972_s4  ;;  %4070 = vmatprep.subr.mxu1 %v4449_v37  ;;  %s3777_s4 = sshll.u32 %s4990_s29, 4  ;;  %s5339_s4 = int_to_ptr.vmem [resolvable:$true] %s3777_s4 }
  0x18   : > { %v214_v3 = vld [vmem:[%s4549_s7 + $0x68] sm:$0xff]  ;;  %v216_v4 = vld [vmem:[%s4549_s7 + $0x78] sm:$0xf]  ;;  %v213_v5 = vld [vmem:[%s4549_s7 + $0x60] sm:$0xff]  ;;  %v322_v32 = vadd.s32 8, %v4572_v31  ;;  %v323_v36 = vmul.u32 2, %v4572_v31  ;;  %4074 = vmatprep.mubr.msk.f32.mxu1 %vm4451_vm4, %v4449_v37  ;;  %s5337_s6 = scalar_lea.hbm %s5399_s3, %s3973_s30 }
  0x19   : > { %v224_v7 = vpack.c.bf16 %v216_v4, %v214_v3  ;;  %v215_v8 = vld [vmem:[%s4549_s7 + $0x70] sm:$0xf]  ;;  %v210_v9 = vld [vmem:[%s4549_s7 + $0x48] sm:$0xff]  ;;  %v212_v10 = vld [vmem:[%s4549_s7 + $0x58] sm:$0xff]  ;;  %s4369_s8 = scalar_lea.vmem %s5339_s4, 2048 }
  0x1a   : > { %4367 = vset.pattern.permute.xlu1 %v4448_v6  ;;  %v223_v11 = vpack.c.bf16 %v215_v8, %v213_v5  ;;  %v222_v12 = vpack.c.bf16 %v212_v10, %v210_v9  ;;  %v209_v13 = vld [vmem:[%s4549_s7 + $0x40] sm:$0xff]  ;;  %v211_v14 = vld [vmem:[%s4549_s7 + $0x50] sm:$0xff]  ;;  %v206_v15 = vld [vmem:[%s4549_s7 + $0x28] sm:$0xff]  ;;  %v324_v33 = vmul.u32 2, %v322_v32  ;;  %v331_v39 = vadd.s32 1, %v323_v36  ;;  %p4370_p12 = scmp.ne.s32.totalorder %s5339_s4, %s4369_s8 }
  0x1b   : > { %303 = vperm.xlu1 %4367, %v286_v1   ;;  %4365 = vset.pattern.permute.xlu0 %v4448_v6  ;;  %v208_v16 = vld [vmem:[%s4549_s7 + $0x38] sm:$0xff]  ;;  %v221_v18 = vpack.c.bf16 %v211_v14, %v209_v13  ;;  %v205_v20 = vld [vmem:[%s4549_s7 + $0x20] sm:$0xff]  ;;  %v207_v21 = vld [vmem:[%s4549_s7 + $0x30] sm:$0xff]  ;;  %vm4605_vm6 = vcmp.eq.s32.totalorder %v319_v34, %v323_v36 }
  0x1c   : > { %307 = vperm.xlu0 %4365, %v287_v2   ;;  %3865 = vmatprep.subr.msk.bf16.mxu0 %vm236_vm0, %v224_v7  ;;  %v238_v17 = vsel %vm236_vm0, %v223_v11, 0  ;;  %v220_v19 = vpack.c.bf16 %v208_v16, %v206_v15  ;;  %v202_v22 = vld [vmem:[%s4549_s7 + $0x8] sm:$0xff]  ;;  %v204_v23 = vld [vmem:[%s4549_s7 + $0x18] sm:$0xff]  ;;  %v219_v24 = vpack.c.bf16 %v207_v21, %v205_v20  ;;  %v201_v26 = vld [vmem:[%s4549_s7] sm:$0xff]  ;;  %v332_v35 = vadd.s32 1, %v324_v33  ;;  %p4371_p13 = pnand %p4370_p12, %p4523_p4 }
  0x1d   : > { %252 = vmatpush1.bf16.msra.mxu0 %v238_v17  ;;  %v218_v25 = vpack.c.bf16 %v204_v23, %v202_v22  ;;  %v203_v27 = vld [vmem:[%s4549_s7 + $0x10] sm:$0xff]  ;;  %vm4586_vm3 = vcmp.eq.s32.totalorder %v319_v34, %v331_v39  ;;  %vm4598_vm5 = vcmp.eq.s32.totalorder %v319_v34, %v324_v33  ;;  %s5351_s7 = scalar_lea.sflag [#allocation3], %s186_s27 }
  0x1e   : > { %253 = vmatprep.subr.bf16.mxu0 %v222_v12  ;;  %v217_v28 = vpack.c.bf16 %v203_v27, %v201_v26  ;;  %vm4577_vm2 = vcmp.eq.s32.totalorder %v319_v34, %v332_v35  ;;  %p4372_p0 = pneg %p4371_p13 }
  0x1f   : > { %4071 = vmatpush3.msk.msra.mxu1 %vm4577_vm2, %v4450_v40 }
  0x20   : > { %4072 = vmatprep.subr.mxu1 %v4449_v37 }
  0x21   : > { %254 = vmatpush1.bf16.msra.mxu0 %v221_v18  ;;  %4073 = vmatpush3.msk.msra.mxu1 %vm4586_vm3, %v4450_v40 }
  0x22   : > { %255 = vmatprep.subr.bf16.mxu0 %v220_v19  ;;  %4077 = vmatprep.subr.mxu1 %v4449_v37 }
  0x25   : > { %256 = vmatpush1.bf16.msra.mxu0 %v219_v24 }
  0x26   : > { %257 = vmatprep.subr.bf16.mxu0 %v218_v25  ;;  %v4459_v25 = vmov 1966171168  }
  0x27   : > { %v488_v26 = vunpack.c.l.s4 %v4459_v25 }
  0x29   : > { %258 = vmatpush1.bf16.msra.mxu0 %v217_v28  ;;  %v489_v27 = vunpack.c.0.s8 %v488_v26 }
  0x2a   : > { %4105 = vmatprep.subr.mxu0 %v4449_v37 }
  0x2b   : > { %v4970_v33 = vsub.s32 %v489_v27, %v4572_v31 }
  0x2c   : > { %3866 = vmatmul.mubr.msk.bf16.vlgmr.msra.gmra.mxu0 %vm232_vm1, %v4368_v29 }
  0x2d   : > { %4109 = vmatprep.mubr.msk.f32.mxu0 %vm4451_vm4, %v4449_v37  ;;  %4106 = vmatpush3.msk.msra.mxu0 %vm4598_vm5, %v4450_v40 }
  0x2e   : > { %4107 = vmatprep.subr.mxu0 %v4449_v37 }
  0x2f   : > { %4108 = vmatpush3.msk.msra.mxu0 %vm4605_vm6, %v4450_v40 }
  0x30   : > { %4119 = vmatprep.subr.mxu0 %v4449_v37 }
  0x91   : > { %v291_v44 = vpop.permute.xlu1 %290 }
  0x92   : > { %v296_v45 = vpop.permute.xlu0 %295 }
  0x96   : > { %v304_v47 = vpop.permute.xlu1 %303 }
  0x97   : > { %v308_v52 = vpop.permute.xlu0 %307 }
  0xec   : > { %v277_v46 = vpop.f32.mrf.mxu0 }
  0xed   : > { %v298_v48 = vmul.f32 %v291_v44, %v277_v46 }
  0xee   : > { %v279_v49 = vpop.f32.mrf.mxu0 }
  0xef   : > { %v310_v50 = vadd.f32 %v304_v47, %v298_v48  ;;  %v299_v57 = vmul.f32 %v291_v44, %v279_v49 }
  0xf0   : > { %v281_v51 = vpop.f32.mrf.mxu0 }
  0xf1   : > { %v314_v53 = vmax.f32 %v310_v50, 0.0  ;;  %v300_v54 = vmul.f32 %v296_v45, %v281_v51  ;;  %v311_v59 = vadd.f32 %v304_v47, %v299_v57 }
  0xf2   : > { %v283_v58 = vpop.f32.mrf.mxu0 }
  0xf3   : > { %v312_v55 = vadd.f32 %v308_v52, %v300_v54  ;;  %627 = vrot.lane.b32.xlu0 %v314_v53, %s4452_s10  ;;  %v301_v60 = vmul.f32 %v296_v45, %v283_v58  ;;  %v4644_v61 = vmax.f32 %v311_v59, 0.0 }
  0xf5   : > { %v316_v56 = vmax.f32 %v312_v55, 0.0  ;;  %v313_v62 = vadd.f32 %v308_v52, %v301_v60 }
  0xf7   : > { %841 = vrot.lane.b32.xlu0 %v314_v53, %s4453_s11  ;;  %553 = vrot.lane.b32.xlu1 %v316_v56, %s4452_s10  ;;  %v4648_v63 = vmax.f32 %v313_v62, 0.0 }
  0xf8   : > { %4075 = vmatmul.mubr.msk.f32.vlgmr.msra.gmra.mxu1 %vm339_vm7, %v316_v56 }
  0xf9   : > { %4078 = vmatpush3.msk.msra.mxu1 %vm4598_vm5, %v4450_v40  ;;  %4081 = vmatprep.mubr.msk.f32.mxu1 %vm4451_vm4, %v4449_v37 }
  0xfa   : > { %4079 = vmatprep.subr.mxu1 %v4449_v37 }
  0xfb   : > { %4080 = vmatpush3.msk.msra.mxu1 %vm4605_vm6, %v4450_v40  ;;  %1055 = vrot.lane.b32.xlu0 %v314_v53, %s4454_s18 }
  0xfc   : > { %767 = vrot.lane.b32.xlu1 %v316_v56, %s4453_s11  ;;  %4082 = vmatmul.mubr.msk.f32.vlgmr.msra.gmra.mxu1 %vm339_vm7, %v314_v53 }
  0xfd   : > { %4084 = vmatprep.subr.mxu1 %v4449_v37  ;;  %4088 = vmatprep.mubr.msk.f32.mxu1 %vm4451_vm4, %v4449_v37 }
  0xfe   : > { %4085 = vmatpush3.msk.msra.mxu1 %vm4577_vm2, %v4450_v40 }
  0xff   : > { %1269 = vrot.lane.b32.xlu0 %v314_v53, %s4455_s19  ;;  %4086 = vmatprep.subr.mxu1 %v4449_v37 }
 0x100   : > { %981 = vrot.lane.b32.xlu1 %v316_v56, %s4454_s18  ;;  %4087 = vmatpush3.msk.msra.mxu1 %vm4586_vm3, %v4450_v40 }
 0x101   : > { %4091 = vmatprep.subr.mxu1 %v4449_v37 }
 0x103   : > { %1483 = vrot.lane.b32.xlu0 %v314_v53, %s4456_s21 }
 0x104   : > { %1195 = vrot.lane.b32.xlu1 %v316_v56, %s4455_s19 }
 0x107   : > { %1697 = vrot.lane.b32.xlu0 %v314_v53, %s4457_s23 }
 0x108   : > { %1409 = vrot.lane.b32.xlu1 %v316_v56, %s4456_s21 }
 0x10b   : > { %1911 = vrot.lane.b32.xlu0 %v314_v53, %s4458_s26 }
 0x10c   : > { %1623 = vrot.lane.b32.xlu1 %v316_v56, %s4457_s23 }
 0x10f   : > { %2337 = vrot.lane.b32.xlu0 %v4644_v61, %s4452_s10 }
 0x110   : > { %1837 = vrot.lane.b32.xlu1 %v316_v56, %s4458_s26 }
 0x113   : > { %2551 = vrot.lane.b32.xlu0 %v4644_v61, %s4453_s11 }
 0x114   : > { %2263 = vrot.lane.b32.xlu1 %v4648_v63, %s4452_s10  ;;  %s4373_s10 = sshll.u32 %s4460_s9, 4  ;;  %s4374_s10 = int_to_ptr.vmem [resolvable:$false] %s4373_s10 }
 0x115   : > { %p4376_p1 = scmp.lt.s32.totalorder %s5339_s4, %s4374_s10 }
 0x117   : > { %2765 = vrot.lane.b32.xlu0 %v4644_v61, %s4454_s18 }
 0x118   : > { %2477 = vrot.lane.b32.xlu1 %v4648_v63, %s4453_s11  ;;  %s4375_s11 = scalar_lea.vmem %s4374_s10, 4096 }
 0x119   : > { %p4377_p2 = scmp.lt.s32.totalorder %s4375_s11, %s4369_s8 }
 0x11b   : > { %2979 = vrot.lane.b32.xlu0 %v4644_v61, %s4455_s19  ;;  %p4378_p3 = por %p4377_p2, %p4376_p1 }
 0x11c   : > { %2691 = vrot.lane.b32.xlu1 %v4648_v63, %s4454_s18 }
 0x11d   : > { %p4379_p5 = pnand %p4378_p3, %p4372_p0 }
 0x11f   : > { %3193 = vrot.lane.b32.xlu0 %v4644_v61, %s4456_s21 }
 0x120   : > { %2905 = vrot.lane.b32.xlu1 %v4648_v63, %s4455_s19 }
 0x123   : > { %3407 = vrot.lane.b32.xlu0 %v4644_v61, %s4457_s23 }
 0x124   : > { %3119 = vrot.lane.b32.xlu1 %v4648_v63, %s4456_s21 }
 0x127   : > { %3621 = vrot.lane.b32.xlu0 %v4644_v61, %s4458_s26 }
 0x128   : > { %3333 = vrot.lane.b32.xlu1 %v4648_v63, %s4457_s23 }
 0x12c   : > { %3547 = vrot.lane.b32.xlu1 %v4648_v63, %s4458_s26 }
 0x165   : > { %v628_v0 = vpop.permute.xlu0 %627 }
 0x169   : > { %v842_v1 = vpop.permute.xlu0 %841  ;;  %v554_v2 = vpop.permute.xlu1 %553 }
 0x16a   : > { %4089 = vmatmul.mubr.msk.f32.vlgmr.msra.gmra.mxu1 %vm339_vm7, %v554_v2  ;;  %4110 = vmatmul.mubr.msk.f32.vlgmr.msra.gmra.mxu0 %vm339_vm7, %v842_v1 }
 0x16b   : > { %4092 = vmatpush3.msk.msra.mxu1 %vm4598_vm5, %v4450_v40  ;;  %4120 = vmatpush3.msk.msra.mxu0 %vm4598_vm5, %v4450_v40 }
 0x16c   : > { %4093 = vmatprep.subr.mxu1 %v4449_v37  ;;  %4121 = vmatprep.subr.mxu0 %v4449_v37 }
 0x16d   : > { %4094 = vmatpush3.msk.msra.mxu1 %vm4605_vm6, %v4450_v40  ;;  %4122 = vmatpush3.msk.msra.mxu0 %vm4605_vm6, %v4450_v40  ;;  %v1056_v3 = vpop.permute.xlu0 %1055 }
 0x16e   : > { %4123 = vmatprep.mubr.msk.f32.mxu0 %vm4451_vm4, %v4449_v37  ;;  %4095 = vmatprep.mubr.msk.f32.mxu1 %vm4451_vm4, %v4449_v37  ;;  %v768_v5 = vpop.permute.xlu1 %767 }
 0x16f   : > { %4098 = vmatprep.subr.mxu1 %v4449_v37  ;;  %4096 = vmatmul.mubr.msk.f32.vlgmr.msra.gmra.mxu1 %vm339_vm7, %v628_v0 }
 0x170   : > { %4099 = vmatpush3.msk.msra.mxu1 %vm4577_vm2, %v4450_v40  ;;  %4124 = vmatmul.mubr.msk.f32.vlgmr.msra.gmra.mxu0 %vm339_vm7, %v1056_v3 }
 0x171   : > { %4133 = vmatprep.subr.mxu0 %v4449_v37  ;;  %4100 = vmatprep.subr.mxu1 %v4449_v37  ;;  %v1270_v4 = vpop.permute.xlu0 %1269 }
 0x172   : > { %4134 = vmatpush3.msk.msra.mxu0 %vm4598_vm5, %v4450_v40  ;;  %4101 = vmatpush3.msk.msra.mxu1 %vm4586_vm3, %v4450_v40  ;;  %v982_v7 = vpop.permute.xlu1 %981 }
 0x173   : > { %4135 = vmatprep.subr.mxu0 %v4449_v37  ;;  %4137 = vmatprep.mubr.msk.f32.mxu0 %vm4451_vm4, %v4449_v37 }
 0x174   : > { %4136 = vmatpush3.msk.msra.mxu0 %vm4605_vm6, %v4450_v40  ;;  %4102 = vmatprep.mubr.msk.f32.mxu1 %vm4451_vm4, %v4449_v37 }
 0x175   : > { %4112 = vmatprep.subr.mxu1 %v4449_v37  ;;  %4103 = vmatmul.mubr.msk.f32.vlgmr.msra.gmra.mxu1 %vm339_vm7, %v768_v5  ;;  %v1484_v6 = vpop.permute.xlu0 %1483 }
 0x176   : > { %4113 = vmatpush3.msk.msra.mxu1 %vm4577_vm2, %v4450_v40  ;;  %4138 = vmatmul.mubr.msk.f32.vlgmr.msra.gmra.mxu0 %vm339_vm7, %v1270_v4  ;;  %v1196_v9 = vpop.permute.xlu1 %1195 }
 0x177   : > { %4147 = vmatprep.subr.mxu0 %v4449_v37  ;;  %4114 = vmatprep.subr.mxu1 %v4449_v37 }
 0x178   : > { %4148 = vmatpush3.msk.msra.mxu0 %vm4598_vm5, %v4450_v40  ;;  %4115 = vmatpush3.msk.msra.mxu1 %vm4586_vm3, %v4450_v40 }
 0x179   : > { %4149 = vmatprep.subr.mxu0 %v4449_v37  ;;  %4151 = vmatprep.mubr.msk.f32.mxu0 %vm4451_vm4, %v4449_v37  ;;  %v1698_v8 = vpop.permute.xlu0 %1697 }
 0x17a   : > { %4150 = vmatpush3.msk.msra.mxu0 %vm4605_vm6, %v4450_v40  ;;  %4116 = vmatprep.mubr.msk.f32.mxu1 %vm4451_vm4, %v4449_v37  ;;  %v1410_v11 = vpop.permute.xlu1 %1409 }
 0x17b   : > { %4126 = vmatprep.subr.mxu1 %v4449_v37  ;;  %4117 = vmatmul.mubr.msk.f32.vlgmr.msra.gmra.mxu1 %vm339_vm7, %v982_v7 }
 0x17c   : > { %4127 = vmatpush3.msk.msra.mxu1 %vm4577_vm2, %v4450_v40  ;;  %4152 = vmatmul.mubr.msk.f32.vlgmr.msra.gmra.mxu0 %vm339_vm7, %v1484_v6 }
 0x17d   : > { %4161 = vmatprep.subr.mxu0 %v4449_v37  ;;  %4128 = vmatprep.subr.mxu1 %v4449_v37  ;;  %v1912_v10 = vpop.permute.xlu0 %1911 }
 0x17e   : > { %4162 = vmatpush3.msk.msra.mxu0 %vm4598_vm5, %v4450_v40  ;;  %4129 = vmatpush3.msk.msra.mxu1 %vm4586_vm3, %v4450_v40  ;;  %v1624_v12 = vpop.permute.xlu1 %1623 }
 0x17f   : > { %4163 = vmatprep.subr.mxu0 %v4449_v37  ;;  %4165 = vmatprep.mubr.msk.f32.mxu0 %vm4451_vm4, %v4449_v37 }
 0x180   : > { %4164 = vmatpush3.msk.msra.mxu0 %vm4605_vm6, %v4450_v40  ;;  %4130 = vmatprep.mubr.msk.f32.mxu1 %vm4451_vm4, %v4449_v37 }
 0x181   : > { %4140 = vmatprep.subr.mxu1 %v4449_v37  ;;  %4131 = vmatmul.mubr.msk.f32.vlgmr.msra.gmra.mxu1 %vm339_vm7, %v1196_v9  ;;  %v2338_v14 = vpop.permute.xlu0 %2337 }
 0x182   : > { %4141 = vmatpush3.msk.msra.mxu1 %vm4577_vm2, %v4450_v40  ;;  %4166 = vmatmul.mubr.msk.f32.vlgmr.msra.gmra.mxu0 %vm339_vm7, %v1698_v8  ;;  %v1838_v13 = vpop.permute.xlu1 %1837 }
 0x183   : > { %4175 = vmatprep.subr.mxu0 %v4449_v37  ;;  %4142 = vmatprep.subr.mxu1 %v4449_v37 }
 0x184   : > { %4176 = vmatpush3.msk.msra.mxu0 %vm4598_vm5, %v4450_v40  ;;  %4143 = vmatpush3.msk.msra.mxu1 %vm4586_vm3, %v4450_v40 }
 0x185   : > { %4177 = vmatprep.subr.mxu0 %v4449_v37  ;;  %4179 = vmatprep.mubr.msk.f32.mxu0 %vm4451_vm4, %v4449_v37  ;;  %v2552_v15 = vpop.permute.xlu0 %2551 }
 0x186   : > { %4178 = vmatpush3.msk.msra.mxu0 %vm4605_vm6, %v4450_v40  ;;  %4144 = vmatprep.mubr.msk.f32.mxu1 %vm4451_vm4, %v4449_v37  ;;  %v2264_v16 = vpop.permute.xlu1 %2263 }
 0x187   : > { %4154 = vmatprep.subr.mxu1 %v4449_v37  ;;  %4145 = vmatmul.mubr.msk.f32.vlgmr.msra.gmra.mxu1 %vm339_vm7, %v1410_v11 }
 0x188   : > { %4155 = vmatpush3.msk.msra.mxu1 %vm4577_vm2, %v4450_v40  ;;  %4180 = vmatmul.mubr.msk.f32.vlgmr.msra.gmra.mxu0 %vm339_vm7, %v1912_v10 }
 0x189   : > { %4189 = vmatprep.subr.mxu0 %v4449_v37  ;;  %4156 = vmatprep.subr.mxu1 %v4449_v37  ;;  %v2766_v17 = vpop.permute.xlu0 %2765 }
 0x18a   : > { %4190 = vmatpush3.msk.msra.mxu0 %vm4598_vm5, %v4450_v40  ;;  %4157 = vmatpush3.msk.msra.mxu1 %vm4586_vm3, %v4450_v40  ;;  %v2478_v18 = vpop.permute.xlu1 %2477 }
 0x18b   : > { %4191 = vmatprep.subr.mxu0 %v4449_v37  ;;  %4193 = vmatprep.mubr.msk.f32.mxu0 %vm4451_vm4, %v4449_v37 }
 0x18c   : > { %4192 = vmatpush3.msk.msra.mxu0 %vm4605_vm6, %v4450_v40  ;;  %4158 = vmatprep.mubr.msk.f32.mxu1 %vm4451_vm4, %v4449_v37 }
 0x18d   : > { %4168 = vmatprep.subr.mxu1 %v4449_v37  ;;  %4159 = vmatmul.mubr.msk.f32.vlgmr.msra.gmra.mxu1 %vm339_vm7, %v1624_v12  ;;  %v2980_v19 = vpop.permute.xlu0 %2979 }
 0x18e   : > { %4169 = vmatpush3.msk.msra.mxu1 %vm4577_vm2, %v4450_v40  ;;  %4194 = vmatmul.mubr.msk.f32.vlgmr.msra.gmra.mxu0 %vm339_vm7, %v4644_v61  ;;  %v2692_v20 = vpop.permute.xlu1 %2691 }
 0x18f   : > { %4203 = vmatprep.subr.mxu0 %v4449_v37  ;;  %4170 = vmatprep.subr.mxu1 %v4449_v37 }
 0x190   : > { %4204 = vmatpush3.msk.msra.mxu0 %vm4598_vm5, %v4450_v40  ;;  %4171 = vmatpush3.msk.msra.mxu1 %vm4586_vm3, %v4450_v40 }
 0x191   : > { %4205 = vmatprep.subr.mxu0 %v4449_v37  ;;  %4172 = vmatprep.mubr.msk.f32.mxu1 %vm4451_vm4, %v4449_v37  ;;  %v3194_v21 = vpop.permute.xlu0 %3193 }
 0x192   : > { %4182 = vmatprep.subr.mxu1 %v4449_v37  ;;  %4206 = vmatpush3.msk.msra.mxu0 %vm4605_vm6, %v4450_v40  ;;  %v2906_v22 = vpop.permute.xlu1 %2905 }
 0x193   : > { %4207 = vmatprep.mubr.msk.f32.mxu0 %vm4451_vm4, %v4449_v37  ;;  %4173 = vmatmul.mubr.msk.f32.vlgmr.msra.gmra.mxu1 %vm339_vm7, %v1838_v13 }
 0x194   : > { %4183 = vmatpush3.msk.msra.mxu1 %vm4577_vm2, %v4450_v40  ;;  %4208 = vmatmul.mubr.msk.f32.vlgmr.msra.gmra.mxu0 %vm339_vm7, %v2338_v14 }
 0x195   : > { %4217 = vmatprep.subr.mxu0 %v4449_v37  ;;  %4184 = vmatprep.subr.mxu1 %v4449_v37  ;;  %v3408_v23 = vpop.permute.xlu0 %3407 }
 0x196   : > { %4218 = vmatpush3.msk.msra.mxu0 %vm4598_vm5, %v4450_v40  ;;  %4185 = vmatpush3.msk.msra.mxu1 %vm4586_vm3, %v4450_v40  ;;  %v3120_v24 = vpop.permute.xlu1 %3119 }
 0x197   : > { %4219 = vmatprep.subr.mxu0 %v4449_v37  ;;  %4186 = vmatprep.mubr.msk.f32.mxu1 %vm4451_vm4, %v4449_v37 }
 0x198   : > { %4196 = vmatprep.subr.mxu1 %v4449_v37  ;;  %4220 = vmatpush3.msk.msra.mxu0 %vm4605_vm6, %v4450_v40 }
 0x199   : > { %4221 = vmatprep.mubr.msk.f32.mxu0 %vm4451_vm4, %v4449_v37  ;;  %4187 = vmatmul.mubr.msk.f32.vlgmr.msra.gmra.mxu1 %vm339_vm7, %v4648_v63  ;;  %v3622_v28 = vpop.permute.xlu0 %3621 }
 0x19a   : > { %4197 = vmatpush3.msk.msra.mxu1 %vm4577_vm2, %v4450_v40  ;;  %4222 = vmatmul.mubr.msk.f32.vlgmr.msra.gmra.mxu0 %vm339_vm7, %v2552_v15  ;;  %v3334_v29 = vpop.permute.xlu1 %3333 }
 0x19b   : > { %4231 = vmatprep.subr.mxu0 %v4449_v37  ;;  %4198 = vmatprep.subr.mxu1 %v4449_v37 }
 0x19c   : > { %4232 = vmatpush3.msk.msra.mxu0 %vm4598_vm5, %v4450_v40  ;;  %4199 = vmatpush3.msk.msra.mxu1 %vm4586_vm3, %v4450_v40 }
 0x19d   : > { %4233 = vmatprep.subr.mxu0 %v4449_v37  ;;  %4235 = vmatprep.mubr.msk.f32.mxu0 %vm4451_vm4, %v4449_v37 }
 0x19e   : > { %4234 = vmatpush3.msk.msra.mxu0 %vm4605_vm6, %v4450_v40  ;;  %4200 = vmatprep.mubr.msk.f32.mxu1 %vm4451_vm4, %v4449_v37  ;;  %v3548_v36 = vpop.permute.xlu1 %3547 }
 0x19f   : > { %4210 = vmatprep.subr.mxu1 %v4449_v37  ;;  %4201 = vmatmul.mubr.msk.f32.vlgmr.msra.gmra.mxu1 %vm339_vm7, %v2264_v16 }
 0x1a0   : > { %4211 = vmatpush3.msk.msra.mxu1 %vm4577_vm2, %v4450_v40  ;;  %4236 = vmatmul.mubr.msk.f32.vlgmr.msra.gmra.mxu0 %vm339_vm7, %v2766_v17 }
 0x1a1   : > { %4245 = vmatprep.subr.mxu0 %v4449_v37  ;;  %4212 = vmatprep.subr.mxu1 %v4449_v37 }
 0x1a2   : > { %4246 = vmatpush3.msk.msra.mxu0 %vm4598_vm5, %v4450_v40  ;;  %4213 = vmatpush3.msk.msra.mxu1 %vm4586_vm3, %v4450_v40 }
 0x1a3   : > { %4247 = vmatprep.subr.mxu0 %v4449_v37  ;;  %4249 = vmatprep.mubr.msk.f32.mxu0 %vm4451_vm4, %v4449_v37 }
 0x1a4   : > { %4248 = vmatpush3.msk.msra.mxu0 %vm4605_vm6, %v4450_v40  ;;  %4214 = vmatprep.mubr.msk.f32.mxu1 %vm4451_vm4, %v4449_v37 }
 0x1a5   : > { %4224 = vmatprep.subr.mxu1 %v4449_v37  ;;  %4215 = vmatmul.mubr.msk.f32.vlgmr.msra.gmra.mxu1 %vm339_vm7, %v2478_v18 }
 0x1a6   : > { %4225 = vmatpush3.msk.msra.mxu1 %vm4577_vm2, %v4450_v40  ;;  %4250 = vmatmul.mubr.msk.f32.vlgmr.msra.gmra.mxu0 %vm339_vm7, %v2980_v19 }
 0x1a7   : > { %4259 = vmatprep.subr.mxu0 %v4449_v37  ;;  %4226 = vmatprep.subr.mxu1 %v4449_v37 }
 0x1a8   : > { %4260 = vmatpush3.msk.msra.mxu0 %vm4598_vm5, %v4450_v40  ;;  %4227 = vmatpush3.msk.msra.mxu1 %vm4586_vm3, %v4450_v40 }
 0x1a9   : > { %4261 = vmatprep.subr.mxu0 %v4449_v37  ;;  %4263 = vmatprep.mubr.msk.f32.mxu0 %vm4451_vm4, %v4449_v37 }
 0x1aa   : > { %4262 = vmatpush3.msk.msra.mxu0 %vm4605_vm6, %v4450_v40  ;;  %4228 = vmatprep.mubr.msk.f32.mxu1 %vm4451_vm4, %v4449_v37 }
 0x1ab   : > { %4238 = vmatprep.subr.mxu1 %v4449_v37  ;;  %4229 = vmatmul.mubr.msk.f32.vlgmr.msra.gmra.mxu1 %vm339_vm7, %v2692_v20 }
 0x1ac   : > { %4239 = vmatpush3.msk.msra.mxu1 %vm4577_vm2, %v4450_v40  ;;  %4264 = vmatmul.mubr.msk.f32.vlgmr.msra.gmra.mxu0 %vm339_vm7, %v3194_v21 }
 0x1ad   : > { %4273 = vmatprep.subr.mxu0 %v4449_v37  ;;  %4240 = vmatprep.subr.mxu1 %v4449_v37 }
 0x1ae   : > { %4274 = vmatpush3.msk.msra.mxu0 %vm4598_vm5, %v4450_v40  ;;  %4241 = vmatpush3.msk.msra.mxu1 %vm4586_vm3, %v4450_v40 }
 0x1af   : > { %4275 = vmatprep.subr.mxu0 %v4449_v37  ;;  %4277 = vmatprep.mubr.msk.f32.mxu0 %vm4451_vm4, %v4449_v37 }
 0x1b0   : > { %4276 = vmatpush3.msk.msra.mxu0 %vm4605_vm6, %v4450_v40  ;;  %4242 = vmatprep.mubr.msk.f32.mxu1 %vm4451_vm4, %v4449_v37 }
 0x1b1   : > { %4252 = vmatprep.subr.mxu1 %v4449_v37  ;;  %4243 = vmatmul.mubr.msk.f32.vlgmr.msra.gmra.mxu1 %vm339_vm7, %v2906_v22 }
 0x1b2   : > { %4253 = vmatpush3.msk.msra.mxu1 %vm4577_vm2, %v4450_v40  ;;  %4278 = vmatmul.mubr.msk.f32.vlgmr.msra.gmra.mxu0 %vm339_vm7, %v3408_v23 }
 0x1b3   : > { %4287 = vmatprep.subr.mxu0 %v4449_v37  ;;  %4254 = vmatprep.subr.mxu1 %v4449_v37 }
 0x1b4   : > { %4288 = vmatpush3.msk.msra.mxu0 %vm4598_vm5, %v4450_v40  ;;  %4255 = vmatpush3.msk.msra.mxu1 %vm4586_vm3, %v4450_v40 }
 0x1b5   : > { %4289 = vmatprep.subr.mxu0 %v4449_v37  ;;  %4291 = vmatprep.mubr.msk.f32.mxu0 %vm4451_vm4, %v4449_v37 }
 0x1b6   : > { %4290 = vmatpush3.msk.msra.mxu0 %vm4605_vm6, %v4450_v40  ;;  %4256 = vmatprep.mubr.msk.f32.mxu1 %vm4451_vm4, %v4449_v37 }
 0x1b7   : > { %4266 = vmatprep.subr.mxu1 %v4449_v37  ;;  %4257 = vmatmul.mubr.msk.f32.vlgmr.msra.gmra.mxu1 %vm339_vm7, %v3120_v24 }
 0x1b8   : > { %4267 = vmatpush3.msk.msra.mxu1 %vm4577_vm2, %v4450_v40  ;;  %4292 = vmatmul.mubr.msk.f32.vlgmr.msra.gmra.mxu0 %vm339_vm7, %v3622_v28  ;;  %v409_v30 = vpop.f32.mrf.mxu1 }
 0x1b9   : > { %4268 = vmatprep.subr.mxu1 %v4449_v37  ;;  %4270 = vmatprep.mubr.msk.f32.mxu1 %vm4451_vm4, %v4449_v37 }
 0x1ba   : > { %4269 = vmatpush3.msk.msra.mxu1 %vm4586_vm3, %v4450_v40  ;;  %v4076_v32 = vpop.f32.mrf.mxu1 }
 0x1bb   : > { %4280 = vmatprep.subr.mxu1 %v4449_v37  ;;  %4271 = vmatmul.mubr.msk.f32.vlgmr.msra.gmra.mxu1 %vm339_vm7, %v3334_v29 }
 0x1bc   : > { %4281 = vmatpush3.msk.msra.mxu1 %vm4577_vm2, %v4450_v40  ;;  %4284 = vmatprep.mubr.msk.f32.mxu1 %vm4451_vm4, %v4449_v37  ;;  %v482_v34 = vpop.f32.mrf.mxu1 }
 0x1bd   : > { %4282 = vmatprep.subr.mxu1 %v4449_v37  ;;  %v483_v35 = vadd.f32 %v482_v34, %v409_v30 }
 0x1be   : > { %4283 = vmatpush3.msk.msra.mxu1 %vm4586_vm3, %v4450_v40  ;;  %v4083_v31 = vpop.f32.mrf.mxu1 }
 0x1bf   : > { %4285 = vmatmul.mubr.msk.f32.vlgmr.msra.gmra.mxu1 %vm339_vm7, %v3548_v36  ;;  %v493_v38 = vrot.slane %v483_v35, %v4970_v33  ;;  %v520_v39 = vcombine.high %v483_v35, %v483_v35 }
 0x1c1   : > { %v494_v42 = vcombine.high %v493_v38, %v493_v38  ;;  %v501_v43 = vrot.slane %v493_v38, %v4970_v33  ;;  %v527_v37 = vrot.slane %v520_v39, %v4970_v33 }
 0x1c3   : > { %v508_v44 = vrot.slane %v494_v42, %v4970_v33  ;;  %v509_v45 = vcombine.high %v501_v43, %v501_v43  ;;  %516 = vst.msk [vmem:[%s4990_s29] sm:$0x1] %vm515_vm8, %v501_v43  ;;  %v528_v40 = vcombine.high %v527_v37, %v527_v37  ;;  %v535_v41 = vrot.slane %v527_v37, %v4970_v33 }
 0x1c5   : > { %v510_v46 = vcombine.high %v508_v44, %v508_v44  ;;  %517 = vst.msk [vmem:[%s4990_s29 + $0x20] sm:$0x1] %vm515_vm8, %v508_v44  ;;  %518 = vst.msk [vmem:[%s4990_s29 + $0x40] sm:$0x1] %vm515_vm8, %v509_v45  ;;  %v542_v47 = vrot.slane %v528_v40, %v4970_v33  ;;  %v543_v48 = vcombine.high %v535_v41, %v535_v41 }
 0x1c6   : > { %549 = vst.msk [vmem:[%s4990_s29 + $0x1] sm:$0x1] %vm515_vm8, %v535_v41 }
 0x1c7   : > { %519 = vst.msk [vmem:[%s4990_s29 + $0x60] sm:$0x1] %vm515_vm8, %v510_v46  ;;  %v544_v49 = vcombine.high %v542_v47, %v542_v47  ;;  %550 = vst.msk [vmem:[%s4990_s29 + $0x21] sm:$0x1] %vm515_vm8, %v542_v47 }
 0x1c8   : > { %551 = vst.msk [vmem:[%s4990_s29 + $0x41] sm:$0x1] %vm515_vm8, %v543_v48 }
 0x1c9   : > { %552 = vst.msk [vmem:[%s4990_s29 + $0x61] sm:$0x1] %vm515_vm8, %v544_v49 }
 0x22a   : > { %v623_v50 = vpop.f32.mrf.mxu1  ;;  %v911_v51 = vpop.f32.mrf.mxu0 }
 0x22c   : > { %v4090_v52 = vpop.f32.mrf.mxu1  ;;  %v4111_v53 = vpop.f32.mrf.mxu0 }
 0x22f   : > { %v697_v54 = vpop.f32.mrf.mxu1 }
 0x230   : > { %v698_v55 = vadd.f32 %v697_v54, %v623_v50  ;;  %v1125_v56 = vpop.f32.mrf.mxu0 }
 0x231   : > { %v4097_v57 = vpop.f32.mrf.mxu1 }
 0x232   : > { %v708_v58 = vrot.slane %v698_v55, %v4970_v33  ;;  %v734_v59 = vcombine.high %v698_v55, %v698_v55  ;;  %v4125_v60 = vpop.f32.mrf.mxu0 }
 0x234   : > { %v709_v61 = vcombine.high %v708_v58, %v708_v58  ;;  %v716_v62 = vrot.slane %v708_v58, %v4970_v33  ;;  %v741_v63 = vrot.slane %v734_v59, %v4970_v33 }
 0x235   : > { %v837_v0 = vpop.f32.mrf.mxu1 }
 0x236   : > { %v723_v1 = vrot.slane %v709_v61, %v4970_v33  ;;  %v724_v2 = vcombine.high %v716_v62, %v716_v62  ;;  %730 = vst.msk [vmem:[%s4990_s29 + $0x2] sm:$0x1] %vm515_vm8, %v716_v62  ;;  %v742_v3 = vcombine.high %v741_v63, %v741_v63  ;;  %v749_v4 = vrot.slane %v741_v63, %v4970_v33  ;;  %v1339_v5 = vpop.f32.mrf.mxu0 }
 0x237   : > { %v912_v6 = vadd.f32 %v911_v51, %v837_v0  ;;  %v4104_v7 = vpop.f32.mrf.mxu1 }
 0x238   : > { %v725_v8 = vcombine.high %v723_v1, %v723_v1  ;;  %731 = vst.msk [vmem:[%s4990_s29 + $0x22] sm:$0x1] %vm515_vm8, %v723_v1  ;;  %732 = vst.msk [vmem:[%s4990_s29 + $0x42] sm:$0x1] %vm515_vm8, %v724_v2  ;;  %v756_v9 = vrot.slane %v742_v3, %v4970_v33  ;;  %v757_v10 = vcombine.high %v749_v4, %v749_v4  ;;  %v4139_v11 = vpop.f32.mrf.mxu0 }
 0x239   : > { %763 = vst.msk [vmem:[%s4990_s29 + $0x3] sm:$0x1] %vm515_vm8, %v749_v4  ;;  %v922_v12 = vrot.slane %v912_v6, %v4970_v33  ;;  %v948_v13 = vcombine.high %v912_v6, %v912_v6 }
 0x23a   : > { %733 = vst.msk [vmem:[%s4990_s29 + $0x62] sm:$0x1] %vm515_vm8, %v725_v8  ;;  %v758_v14 = vcombine.high %v756_v9, %v756_v9  ;;  %764 = vst.msk [vmem:[%s4990_s29 + $0x23] sm:$0x1] %vm515_vm8, %v756_v9 }
 0x23b   : > { %765 = vst.msk [vmem:[%s4990_s29 + $0x43] sm:$0x1] %vm515_vm8, %v757_v10  ;;  %v923_v15 = vcombine.high %v922_v12, %v922_v12  ;;  %v930_v16 = vrot.slane %v922_v12, %v4970_v33  ;;  %v955_v17 = vrot.slane %v948_v13, %v4970_v33  ;;  %v1051_v18 = vpop.f32.mrf.mxu1 }
 0x23c   : > { %766 = vst.msk [vmem:[%s4990_s29 + $0x63] sm:$0x1] %vm515_vm8, %v758_v14  ;;  %v1126_v19 = vadd.f32 %v1125_v56, %v1051_v18  ;;  %v1553_v20 = vpop.f32.mrf.mxu0 }
 0x23d   : > { %v937_v21 = vrot.slane %v923_v15, %v4970_v33  ;;  %v938_v22 = vcombine.high %v930_v16, %v930_v16  ;;  %944 = vst.msk [vmem:[%s4990_s29 + $0x4] sm:$0x1] %vm515_vm8, %v930_v16  ;;  %v956_v23 = vcombine.high %v955_v17, %v955_v17  ;;  %v963_v24 = vrot.slane %v955_v17, %v4970_v33  ;;  %v4118_v25 = vpop.f32.mrf.mxu1 }
 0x23e   : > { %v1136_v26 = vrot.slane %v1126_v19, %v4970_v33  ;;  %v1162_v27 = vcombine.high %v1126_v19, %v1126_v19  ;;  %v4153_v28 = vpop.f32.mrf.mxu0 }
 0x23f   : > { %v939_v29 = vcombine.high %v937_v21, %v937_v21  ;;  %945 = vst.msk [vmem:[%s4990_s29 + $0x24] sm:$0x1] %vm515_vm8, %v937_v21  ;;  %946 = vst.msk [vmem:[%s4990_s29 + $0x44] sm:$0x1] %vm515_vm8, %v938_v22  ;;  %v970_v30 = vrot.slane %v956_v23, %v4970_v33  ;;  %v971_v32 = vcombine.high %v963_v24, %v963_v24 }
 0x240   : > { %977 = vst.msk [vmem:[%s4990_s29 + $0x5] sm:$0x1] %vm515_vm8, %v963_v24  ;;  %v1137_v34 = vcombine.high %v1136_v26, %v1136_v26  ;;  %v1144_v35 = vrot.slane %v1136_v26, %v4970_v33  ;;  %v1169_v36 = vrot.slane %v1162_v27, %v4970_v33 }
 0x241   : > { %947 = vst.msk [vmem:[%s4990_s29 + $0x64] sm:$0x1] %vm515_vm8, %v939_v29  ;;  %v972_v31 = vcombine.high %v970_v30, %v970_v30  ;;  %978 = vst.msk [vmem:[%s4990_s29 + $0x25] sm:$0x1] %vm515_vm8, %v970_v30  ;;  %v1265_v38 = vpop.f32.mrf.mxu1 }
 0x242   : > { %979 = vst.msk [vmem:[%s4990_s29 + $0x45] sm:$0x1] %vm515_vm8, %v971_v32  ;;  %v1151_v39 = vrot.slane %v1137_v34, %v4970_v33  ;;  %v1152_v42 = vcombine.high %v1144_v35, %v1144_v35  ;;  %1158 = vst.msk [vmem:[%s4990_s29 + $0x6] sm:$0x1] %vm515_vm8, %v1144_v35  ;;  %v1170_v43 = vcombine.high %v1169_v36, %v1169_v36  ;;  %v1767_v44 = vpop.f32.mrf.mxu0 }
 0x243   : > { %v1177_v37 = vrot.slane %v1169_v36, %v4970_v33  ;;  %980 = vst.msk [vmem:[%s4990_s29 + $0x65] sm:$0x1] %vm515_vm8, %v972_v31  ;;  %v1340_v45 = vadd.f32 %v1339_v5, %v1265_v38  ;;  %v4132_v40 = vpop.f32.mrf.mxu1 }
 0x244   : > { %v1153_v41 = vcombine.high %v1151_v39, %v1151_v39  ;;  %1159 = vst.msk [vmem:[%s4990_s29 + $0x26] sm:$0x1] %vm515_vm8, %v1151_v39  ;;  %1160 = vst.msk [vmem:[%s4990_s29 + $0x46] sm:$0x1] %vm515_vm8, %v1152_v42  ;;  %v1184_v46 = vrot.slane %v1170_v43, %v4970_v33  ;;  %v4167_v48 = vpop.f32.mrf.mxu0 }
 0x245   : > { %v1185_v47 = vcombine.high %v1177_v37, %v1177_v37  ;;  %1191 = vst.msk [vmem:[%s4990_s29 + $0x7] sm:$0x1] %vm515_vm8, %v1177_v37  ;;  %v1350_v49 = vrot.slane %v1340_v45, %v4970_v33  ;;  %v1376_v50 = vcombine.high %v1340_v45, %v1340_v45 }
 0x246   : > { %1161 = vst.msk [vmem:[%s4990_s29 + $0x66] sm:$0x1] %vm515_vm8, %v1153_v41  ;;  %v1186_v51 = vcombine.high %v1184_v46, %v1184_v46  ;;  %1192 = vst.msk [vmem:[%s4990_s29 + $0x27] sm:$0x1] %vm515_vm8, %v1184_v46 }
 0x247   : > { %1193 = vst.msk [vmem:[%s4990_s29 + $0x47] sm:$0x1] %vm515_vm8, %v1185_v47  ;;  %v1351_v52 = vcombine.high %v1350_v49, %v1350_v49  ;;  %v1358_v53 = vrot.slane %v1350_v49, %v4970_v33  ;;  %v1383_v54 = vrot.slane %v1376_v50, %v4970_v33  ;;  %v1479_v55 = vpop.f32.mrf.mxu1 }
 0x248   : > { %1194 = vst.msk [vmem:[%s4990_s29 + $0x67] sm:$0x1] %vm515_vm8, %v1186_v51  ;;  %v1554_v56 = vadd.f32 %v1553_v20, %v1479_v55  ;;  %v1981_v57 = vpop.f32.mrf.mxu0 }
 0x249   : > { %v1365_v58 = vrot.slane %v1351_v52, %v4970_v33  ;;  %v1366_v59 = vcombine.high %v1358_v53, %v1358_v53  ;;  %1372 = vst.msk [vmem:[%s4990_s29 + $0x8] sm:$0x1] %vm515_vm8, %v1358_v53  ;;  %v1384_v60 = vcombine.high %v1383_v54, %v1383_v54  ;;  %v1391_v61 = vrot.slane %v1383_v54, %v4970_v33  ;;  %v4146_v62 = vpop.f32.mrf.mxu1 }
 0x24a   : > { %v1564_v63 = vrot.slane %v1554_v56, %v4970_v33  ;;  %v1590_v0 = vcombine.high %v1554_v56, %v1554_v56  ;;  %v4181_v1 = vpop.f32.mrf.mxu0 }
 0x24b   : > { %v1367_v2 = vcombine.high %v1365_v58, %v1365_v58  ;;  %1373 = vst.msk [vmem:[%s4990_s29 + $0x28] sm:$0x1] %vm515_vm8, %v1365_v58  ;;  %1374 = vst.msk [vmem:[%s4990_s29 + $0x48] sm:$0x1] %vm515_vm8, %v1366_v59  ;;  %v1398_v3 = vrot.slane %v1384_v60, %v4970_v33  ;;  %v1399_v4 = vcombine.high %v1391_v61, %v1391_v61 }
 0x24c   : > { %1405 = vst.msk [vmem:[%s4990_s29 + $0x9] sm:$0x1] %vm515_vm8, %v1391_v61  ;;  %v1565_v5 = vcombine.high %v1564_v63, %v1564_v63  ;;  %v1572_v6 = vrot.slane %v1564_v63, %v4970_v33  ;;  %v1597_v7 = vrot.slane %v1590_v0, %v4970_v33 }
 0x24d   : > { %1375 = vst.msk [vmem:[%s4990_s29 + $0x68] sm:$0x1] %vm515_vm8, %v1367_v2  ;;  %v1400_v8 = vcombine.high %v1398_v3, %v1398_v3  ;;  %1406 = vst.msk [vmem:[%s4990_s29 + $0x29] sm:$0x1] %vm515_vm8, %v1398_v3  ;;  %v1693_v9 = vpop.f32.mrf.mxu1 }
 0x24e   : > { %1407 = vst.msk [vmem:[%s4990_s29 + $0x49] sm:$0x1] %vm515_vm8, %v1399_v4  ;;  %v1579_v10 = vrot.slane %v1565_v5, %v4970_v33  ;;  %v1580_v11 = vcombine.high %v1572_v6, %v1572_v6  ;;  %1586 = vst.msk [vmem:[%s4990_s29 + $0xa] sm:$0x1] %vm515_vm8, %v1572_v6  ;;  %v1598_v12 = vcombine.high %v1597_v7, %v1597_v7  ;;  %v2193_v14 = vpop.f32.mrf.mxu0 }
 0x24f   : > { %v1605_v13 = vrot.slane %v1597_v7, %v4970_v33  ;;  %1408 = vst.msk [vmem:[%s4990_s29 + $0x69] sm:$0x1] %vm515_vm8, %v1400_v8  ;;  %v1768_v15 = vadd.f32 %v1767_v44, %v1693_v9  ;;  %v4160_v16 = vpop.f32.mrf.mxu1 }
 0x250   : > { %v1581_v17 = vcombine.high %v1579_v10, %v1579_v10  ;;  %1587 = vst.msk [vmem:[%s4990_s29 + $0x2a] sm:$0x1] %vm515_vm8, %v1579_v10  ;;  %1588 = vst.msk [vmem:[%s4990_s29 + $0x4a] sm:$0x1] %vm515_vm8, %v1580_v11  ;;  %v1612_v18 = vrot.slane %v1598_v12, %v4970_v33  ;;  %v4195_v20 = vpop.f32.mrf.mxu0 }
 0x251   : > { %v1613_v19 = vcombine.high %v1605_v13, %v1605_v13  ;;  %1619 = vst.msk [vmem:[%s4990_s29 + $0xb] sm:$0x1] %vm515_vm8, %v1605_v13  ;;  %v1778_v21 = vrot.slane %v1768_v15, %v4970_v33  ;;  %v1804_v22 = vcombine.high %v1768_v15, %v1768_v15 }
 0x252   : > { %1589 = vst.msk [vmem:[%s4990_s29 + $0x6a] sm:$0x1] %vm515_vm8, %v1581_v17  ;;  %v1614_v23 = vcombine.high %v1612_v18, %v1612_v18  ;;  %1620 = vst.msk [vmem:[%s4990_s29 + $0x2b] sm:$0x1] %vm515_vm8, %v1612_v18 }
 0x253   : > { %1621 = vst.msk [vmem:[%s4990_s29 + $0x4b] sm:$0x1] %vm515_vm8, %v1613_v19  ;;  %v1779_v24 = vcombine.high %v1778_v21, %v1778_v21  ;;  %v1786_v25 = vrot.slane %v1778_v21, %v4970_v33  ;;  %v1811_v26 = vrot.slane %v1804_v22, %v4970_v33  ;;  %v1907_v27 = vpop.f32.mrf.mxu1 }
 0x254   : > { %1622 = vst.msk [vmem:[%s4990_s29 + $0x6b] sm:$0x1] %vm515_vm8, %v1614_v23  ;;  %v1982_v28 = vadd.f32 %v1981_v57, %v1907_v27  ;;  %v2407_v29 = vpop.f32.mrf.mxu0 }
 0x255   : > { %v1793_v30 = vrot.slane %v1779_v24, %v4970_v33  ;;  %v1794_v32 = vcombine.high %v1786_v25, %v1786_v25  ;;  %1800 = vst.msk [vmem:[%s4990_s29 + $0xc] sm:$0x1] %vm515_vm8, %v1786_v25  ;;  %v1812_v34 = vcombine.high %v1811_v26, %v1811_v26  ;;  %v1819_v35 = vrot.slane %v1811_v26, %v4970_v33  ;;  %v4174_v36 = vpop.f32.mrf.mxu1 }
 0x256   : > { %v1992_v31 = vrot.slane %v1982_v28, %v4970_v33  ;;  %v2018_v38 = vcombine.high %v1982_v28, %v1982_v28  ;;  %v4209_v39 = vpop.f32.mrf.mxu0 }
 0x257   : > { %v1795_v42 = vcombine.high %v1793_v30, %v1793_v30  ;;  %1801 = vst.msk [vmem:[%s4990_s29 + $0x2c] sm:$0x1] %vm515_vm8, %v1793_v30  ;;  %1802 = vst.msk [vmem:[%s4990_s29 + $0x4c] sm:$0x1] %vm515_vm8, %v1794_v32  ;;  %v1826_v43 = vrot.slane %v1812_v34, %v4970_v33  ;;  %v1827_v37 = vcombine.high %v1819_v35, %v1819_v35 }
 0x258   : > { %1833 = vst.msk [vmem:[%s4990_s29 + $0xd] sm:$0x1] %vm515_vm8, %v1819_v35  ;;  %v1993_v44 = vcombine.high %v1992_v31, %v1992_v31  ;;  %v2000_v45 = vrot.slane %v1992_v31, %v4970_v33  ;;  %v2025_v40 = vrot.slane %v2018_v38, %v4970_v33 }
 0x259   : > { %1803 = vst.msk [vmem:[%s4990_s29 + $0x6c] sm:$0x1] %vm515_vm8, %v1795_v42  ;;  %v1828_v41 = vcombine.high %v1826_v43, %v1826_v43  ;;  %1834 = vst.msk [vmem:[%s4990_s29 + $0x2d] sm:$0x1] %vm515_vm8, %v1826_v43  ;;  %v2120_v46 = vpop.f32.mrf.mxu1 }
 0x25a   : > { %1835 = vst.msk [vmem:[%s4990_s29 + $0x4d] sm:$0x1] %vm515_vm8, %v1827_v37  ;;  %v2007_v47 = vrot.slane %v1993_v44, %v4970_v33  ;;  %v2008_v48 = vcombine.high %v2000_v45, %v2000_v45  ;;  %2014 = vst.msk [vmem:[%s4990_s29 + $0xe] sm:$0x1] %vm515_vm8, %v2000_v45  ;;  %v2026_v49 = vcombine.high %v2025_v40, %v2025_v40  ;;  %v2621_v51 = vpop.f32.mrf.mxu0 }
 0x25b   : > { %v2033_v50 = vrot.slane %v2025_v40, %v4970_v33  ;;  %1836 = vst.msk [vmem:[%s4990_s29 + $0x6d] sm:$0x1] %vm515_vm8, %v1828_v41  ;;  %v2194_v52 = vadd.f32 %v2193_v14, %v2120_v46  ;;  %v4188_v53 = vpop.f32.mrf.mxu1 }
 0x25c   : > { %v2009_v54 = vcombine.high %v2007_v47, %v2007_v47  ;;  %2015 = vst.msk [vmem:[%s4990_s29 + $0x2e] sm:$0x1] %vm515_vm8, %v2007_v47  ;;  %2016 = vst.msk [vmem:[%s4990_s29 + $0x4e] sm:$0x1] %vm515_vm8, %v2008_v48  ;;  %v2040_v55 = vrot.slane %v2026_v49, %v4970_v33  ;;  %v4223_v57 = vpop.f32.mrf.mxu0 }
 0x25d   : > { %v2041_v56 = vcombine.high %v2033_v50, %v2033_v50  ;;  %2047 = vst.msk [vmem:[%s4990_s29 + $0xf] sm:$0x1] %vm515_vm8, %v2033_v50  ;;  %v2204_v58 = vrot.slane %v2194_v52, %v4970_v33  ;;  %v2230_v59 = vcombine.high %v2194_v52, %v2194_v52 }
 0x25e   : > { %2017 = vst.msk [vmem:[%s4990_s29 + $0x6e] sm:$0x1] %vm515_vm8, %v2009_v54  ;;  %v2042_v60 = vcombine.high %v2040_v55, %v2040_v55  ;;  %2048 = vst.msk [vmem:[%s4990_s29 + $0x2f] sm:$0x1] %vm515_vm8, %v2040_v55 }
 0x25f   : > { %2049 = vst.msk [vmem:[%s4990_s29 + $0x4f] sm:$0x1] %vm515_vm8, %v2041_v56  ;;  %v2205_v61 = vcombine.high %v2204_v58, %v2204_v58  ;;  %v2212_v62 = vrot.slane %v2204_v58, %v4970_v33  ;;  %v2237_v63 = vrot.slane %v2230_v59, %v4970_v33  ;;  %v2333_v0 = vpop.f32.mrf.mxu1 }
 0x260   : > { %2050 = vst.msk [vmem:[%s4990_s29 + $0x6f] sm:$0x1] %vm515_vm8, %v2042_v60  ;;  %v2408_v1 = vadd.f32 %v2407_v29, %v2333_v0  ;;  %v2835_v2 = vpop.f32.mrf.mxu0 }
 0x261   : > { %v2219_v3 = vrot.slane %v2205_v61, %v4970_v33  ;;  %v2220_v4 = vcombine.high %v2212_v62, %v2212_v62  ;;  %2226 = vst.msk [vmem:[%s4990_s29 + $0x10] sm:$0x1] %vm515_vm8, %v2212_v62  ;;  %v2238_v5 = vcombine.high %v2237_v63, %v2237_v63  ;;  %v2245_v6 = vrot.slane %v2237_v63, %v4970_v33  ;;  %v4202_v7 = vpop.f32.mrf.mxu1 }
 0x262   : > { %v2418_v8 = vrot.slane %v2408_v1, %v4970_v33  ;;  %v2444_v9 = vcombine.high %v2408_v1, %v2408_v1  ;;  %v4237_v10 = vpop.f32.mrf.mxu0 }
 0x263   : > { %v2221_v11 = vcombine.high %v2219_v3, %v2219_v3  ;;  %2227 = vst.msk [vmem:[%s4990_s29 + $0x30] sm:$0x1] %vm515_vm8, %v2219_v3  ;;  %2228 = vst.msk [vmem:[%s4990_s29 + $0x50] sm:$0x1] %vm515_vm8, %v2220_v4  ;;  %v2252_v12 = vrot.slane %v2238_v5, %v4970_v33  ;;  %v2253_v13 = vcombine.high %v2245_v6, %v2245_v6 }
 0x264   : > { %2259 = vst.msk [vmem:[%s4990_s29 + $0x11] sm:$0x1] %vm515_vm8, %v2245_v6  ;;  %v2419_v14 = vcombine.high %v2418_v8, %v2418_v8  ;;  %v2426_v15 = vrot.slane %v2418_v8, %v4970_v33  ;;  %v2451_v16 = vrot.slane %v2444_v9, %v4970_v33 }
 0x265   : > { %2229 = vst.msk [vmem:[%s4990_s29 + $0x70] sm:$0x1] %vm515_vm8, %v2221_v11  ;;  %v2254_v17 = vcombine.high %v2252_v12, %v2252_v12  ;;  %2260 = vst.msk [vmem:[%s4990_s29 + $0x31] sm:$0x1] %vm515_vm8, %v2252_v12  ;;  %v2547_v18 = vpop.f32.mrf.mxu1 }
 0x266   : > { %2261 = vst.msk [vmem:[%s4990_s29 + $0x51] sm:$0x1] %vm515_vm8, %v2253_v13  ;;  %v2433_v19 = vrot.slane %v2419_v14, %v4970_v33  ;;  %v2434_v20 = vcombine.high %v2426_v15, %v2426_v15  ;;  %2440 = vst.msk [vmem:[%s4990_s29 + $0x12] sm:$0x1] %vm515_vm8, %v2426_v15  ;;  %v2452_v21 = vcombine.high %v2451_v16, %v2451_v16  ;;  %v3049_v23 = vpop.f32.mrf.mxu0 }
 0x267   : > { %v2459_v22 = vrot.slane %v2451_v16, %v4970_v33  ;;  %2262 = vst.msk [vmem:[%s4990_s29 + $0x71] sm:$0x1] %vm515_vm8, %v2254_v17  ;;  %v2622_v24 = vadd.f32 %v2621_v51, %v2547_v18  ;;  %v4216_v25 = vpop.f32.mrf.mxu1 }
 0x268   : > { %v2435_v26 = vcombine.high %v2433_v19, %v2433_v19  ;;  %2441 = vst.msk [vmem:[%s4990_s29 + $0x32] sm:$0x1] %vm515_vm8, %v2433_v19  ;;  %2442 = vst.msk [vmem:[%s4990_s29 + $0x52] sm:$0x1] %vm515_vm8, %v2434_v20  ;;  %v2466_v27 = vrot.slane %v2452_v21, %v4970_v33  ;;  %v4251_v29 = vpop.f32.mrf.mxu0 }
 0x269   : > { %v2467_v28 = vcombine.high %v2459_v22, %v2459_v22  ;;  %2473 = vst.msk [vmem:[%s4990_s29 + $0x13] sm:$0x1] %vm515_vm8, %v2459_v22  ;;  %v2632_v30 = vrot.slane %v2622_v24, %v4970_v33  ;;  %v2658_v32 = vcombine.high %v2622_v24, %v2622_v24 }
 0x26a   : > { %2443 = vst.msk [vmem:[%s4990_s29 + $0x72] sm:$0x1] %vm515_vm8, %v2435_v26  ;;  %v2468_v34 = vcombine.high %v2466_v27, %v2466_v27  ;;  %2474 = vst.msk [vmem:[%s4990_s29 + $0x33] sm:$0x1] %vm515_vm8, %v2466_v27 }
 0x26b   : > { %2475 = vst.msk [vmem:[%s4990_s29 + $0x53] sm:$0x1] %vm515_vm8, %v2467_v28  ;;  %v2633_v35 = vcombine.high %v2632_v30, %v2632_v30  ;;  %v2640_v36 = vrot.slane %v2632_v30, %v4970_v33  ;;  %v2665_v31 = vrot.slane %v2658_v32, %v4970_v33  ;;  %v2761_v38 = vpop.f32.mrf.mxu1 }
 0x26c   : > { %2476 = vst.msk [vmem:[%s4990_s29 + $0x73] sm:$0x1] %vm515_vm8, %v2468_v34  ;;  %v2836_v39 = vadd.f32 %v2835_v2, %v2761_v38  ;;  %v3263_v42 = vpop.f32.mrf.mxu0 }
 0x26d   : > { %v2647_v43 = vrot.slane %v2633_v35, %v4970_v33  ;;  %v2648_v37 = vcombine.high %v2640_v36, %v2640_v36  ;;  %2654 = vst.msk [vmem:[%s4990_s29 + $0x14] sm:$0x1] %vm515_vm8, %v2640_v36  ;;  %v2666_v44 = vcombine.high %v2665_v31, %v2665_v31  ;;  %v2673_v45 = vrot.slane %v2665_v31, %v4970_v33  ;;  %v4230_v40 = vpop.f32.mrf.mxu1 }
 0x26e   : > { %v2846_v41 = vrot.slane %v2836_v39, %v4970_v33  ;;  %v2872_v46 = vcombine.high %v2836_v39, %v2836_v39  ;;  %v4265_v47 = vpop.f32.mrf.mxu0 }
 0x26f   : > { %v2649_v48 = vcombine.high %v2647_v43, %v2647_v43  ;;  %2655 = vst.msk [vmem:[%s4990_s29 + $0x34] sm:$0x1] %vm515_vm8, %v2647_v43  ;;  %2656 = vst.msk [vmem:[%s4990_s29 + $0x54] sm:$0x1] %vm515_vm8, %v2648_v37  ;;  %v2680_v49 = vrot.slane %v2666_v44, %v4970_v33  ;;  %v2681_v50 = vcombine.high %v2673_v45, %v2673_v45 }
 0x270   : > { %2687 = vst.msk [vmem:[%s4990_s29 + $0x15] sm:$0x1] %vm515_vm8, %v2673_v45  ;;  %v2847_v51 = vcombine.high %v2846_v41, %v2846_v41  ;;  %v2854_v52 = vrot.slane %v2846_v41, %v4970_v33  ;;  %v2879_v53 = vrot.slane %v2872_v46, %v4970_v33 }
 0x271   : > { %2657 = vst.msk [vmem:[%s4990_s29 + $0x74] sm:$0x1] %vm515_vm8, %v2649_v48  ;;  %v2682_v54 = vcombine.high %v2680_v49, %v2680_v49  ;;  %2688 = vst.msk [vmem:[%s4990_s29 + $0x35] sm:$0x1] %vm515_vm8, %v2680_v49  ;;  %v2975_v55 = vpop.f32.mrf.mxu1 }
 0x272   : > { %2689 = vst.msk [vmem:[%s4990_s29 + $0x55] sm:$0x1] %vm515_vm8, %v2681_v50  ;;  %v2861_v56 = vrot.slane %v2847_v51, %v4970_v33  ;;  %v2862_v57 = vcombine.high %v2854_v52, %v2854_v52  ;;  %2868 = vst.msk [vmem:[%s4990_s29 + $0x16] sm:$0x1] %vm515_vm8, %v2854_v52  ;;  %v2880_v58 = vcombine.high %v2879_v53, %v2879_v53  ;;  %v3477_v60 = vpop.f32.mrf.mxu0 }
 0x273   : > { %v2887_v59 = vrot.slane %v2879_v53, %v4970_v33  ;;  %2690 = vst.msk [vmem:[%s4990_s29 + $0x75] sm:$0x1] %vm515_vm8, %v2682_v54  ;;  %v3050_v61 = vadd.f32 %v3049_v23, %v2975_v55  ;;  %v4244_v62 = vpop.f32.mrf.mxu1 }
 0x274   : > { %v2863_v63 = vcombine.high %v2861_v56, %v2861_v56  ;;  %2869 = vst.msk [vmem:[%s4990_s29 + $0x36] sm:$0x1] %vm515_vm8, %v2861_v56  ;;  %2870 = vst.msk [vmem:[%s4990_s29 + $0x56] sm:$0x1] %vm515_vm8, %v2862_v57  ;;  %v2894_v0 = vrot.slane %v2880_v58, %v4970_v33  ;;  %v4279_v2 = vpop.f32.mrf.mxu0 }
 0x275   : > { %v2895_v1 = vcombine.high %v2887_v59, %v2887_v59  ;;  %2901 = vst.msk [vmem:[%s4990_s29 + $0x17] sm:$0x1] %vm515_vm8, %v2887_v59  ;;  %v3060_v3 = vrot.slane %v3050_v61, %v4970_v33  ;;  %v3086_v4 = vcombine.high %v3050_v61, %v3050_v61 }
 0x276   : > { %2871 = vst.msk [vmem:[%s4990_s29 + $0x76] sm:$0x1] %vm515_vm8, %v2863_v63  ;;  %v2896_v5 = vcombine.high %v2894_v0, %v2894_v0  ;;  %2902 = vst.msk [vmem:[%s4990_s29 + $0x37] sm:$0x1] %vm515_vm8, %v2894_v0 }
 0x277   : > { %2903 = vst.msk [vmem:[%s4990_s29 + $0x57] sm:$0x1] %vm515_vm8, %v2895_v1  ;;  %v3061_v6 = vcombine.high %v3060_v3, %v3060_v3  ;;  %v3068_v7 = vrot.slane %v3060_v3, %v4970_v33  ;;  %v3093_v8 = vrot.slane %v3086_v4, %v4970_v33  ;;  %v3189_v9 = vpop.f32.mrf.mxu1 }
 0x278   : > { %2904 = vst.msk [vmem:[%s4990_s29 + $0x77] sm:$0x1] %vm515_vm8, %v2896_v5  ;;  %v3264_v10 = vadd.f32 %v3263_v42, %v3189_v9  ;;  %v3691_v11 = vpop.f32.mrf.mxu0 }
 0x279   : > { %v3075_v12 = vrot.slane %v3061_v6, %v4970_v33  ;;  %v3076_v13 = vcombine.high %v3068_v7, %v3068_v7  ;;  %3082 = vst.msk [vmem:[%s4990_s29 + $0x18] sm:$0x1] %vm515_vm8, %v3068_v7  ;;  %v3094_v14 = vcombine.high %v3093_v8, %v3093_v8  ;;  %v3101_v15 = vrot.slane %v3093_v8, %v4970_v33  ;;  %v4258_v16 = vpop.f32.mrf.mxu1 }
 0x27a   : > { %v3274_v17 = vrot.slane %v3264_v10, %v4970_v33  ;;  %v3300_v18 = vcombine.high %v3264_v10, %v3264_v10  ;;  %v4293_v19 = vpop.f32.mrf.mxu0 }
 0x27b   : > { %v3077_v20 = vcombine.high %v3075_v12, %v3075_v12  ;;  %3083 = vst.msk [vmem:[%s4990_s29 + $0x38] sm:$0x1] %vm515_vm8, %v3075_v12  ;;  %3084 = vst.msk [vmem:[%s4990_s29 + $0x58] sm:$0x1] %vm515_vm8, %v3076_v13  ;;  %v3108_v21 = vrot.slane %v3094_v14, %v4970_v33  ;;  %v3109_v22 = vcombine.high %v3101_v15, %v3101_v15  ;;  %v3403_v23 = vpop.f32.mrf.mxu1 }
 0x27c   : > { %3115 = vst.msk [vmem:[%s4990_s29 + $0x19] sm:$0x1] %vm515_vm8, %v3101_v15  ;;  %v3275_v24 = vcombine.high %v3274_v17, %v3274_v17  ;;  %v3282_v25 = vrot.slane %v3274_v17, %v4970_v33  ;;  %v3307_v26 = vrot.slane %v3300_v18, %v4970_v33  ;;  %v3478_v27 = vadd.f32 %v3477_v60, %v3403_v23 }
 0x27d   : > { %3085 = vst.msk [vmem:[%s4990_s29 + $0x78] sm:$0x1] %vm515_vm8, %v3077_v20  ;;  %v3110_v28 = vcombine.high %v3108_v21, %v3108_v21  ;;  %3116 = vst.msk [vmem:[%s4990_s29 + $0x39] sm:$0x1] %vm515_vm8, %v3108_v21  ;;  %v4272_v29 = vpop.f32.mrf.mxu1 }
 0x27e   : > { %3117 = vst.msk [vmem:[%s4990_s29 + $0x59] sm:$0x1] %vm515_vm8, %v3109_v22  ;;  %v3289_v30 = vrot.slane %v3275_v24, %v4970_v33  ;;  %v3290_v32 = vcombine.high %v3282_v25, %v3282_v25  ;;  %3296 = vst.msk [vmem:[%s4990_s29 + $0x1a] sm:$0x1] %vm515_vm8, %v3282_v25  ;;  %v3308_v34 = vcombine.high %v3307_v26, %v3307_v26 }
 0x27f   : > { %v3315_v35 = vrot.slane %v3307_v26, %v4970_v33  ;;  %3118 = vst.msk [vmem:[%s4990_s29 + $0x79] sm:$0x1] %vm515_vm8, %v3110_v28  ;;  %v3488_v36 = vrot.slane %v3478_v27, %v4970_v33  ;;  %v3514_v31 = vcombine.high %v3478_v27, %v3478_v27  ;;  %v3617_v38 = vpop.f32.mrf.mxu1 }
 0x280   : > { %v3291_v39 = vcombine.high %v3289_v30, %v3289_v30  ;;  %3297 = vst.msk [vmem:[%s4990_s29 + $0x3a] sm:$0x1] %vm515_vm8, %v3289_v30  ;;  %3298 = vst.msk [vmem:[%s4990_s29 + $0x5a] sm:$0x1] %vm515_vm8, %v3290_v32  ;;  %v3322_v42 = vrot.slane %v3308_v34, %v4970_v33  ;;  %v3692_v37 = vadd.f32 %v3691_v11, %v3617_v38 }
 0x281   : > { %v3323_v43 = vcombine.high %v3315_v35, %v3315_v35  ;;  %3329 = vst.msk [vmem:[%s4990_s29 + $0x1b] sm:$0x1] %vm515_vm8, %v3315_v35  ;;  %v3489_v44 = vcombine.high %v3488_v36, %v3488_v36  ;;  %v3496_v45 = vrot.slane %v3488_v36, %v4970_v33  ;;  %v3521_v40 = vrot.slane %v3514_v31, %v4970_v33  ;;  %v4286_v41 = vpop.f32.mrf.mxu1 }
 0x282   : > { %3299 = vst.msk [vmem:[%s4990_s29 + $0x7a] sm:$0x1] %vm515_vm8, %v3291_v39  ;;  %v3324_v46 = vcombine.high %v3322_v42, %v3322_v42  ;;  %3330 = vst.msk [vmem:[%s4990_s29 + $0x3b] sm:$0x1] %vm515_vm8, %v3322_v42  ;;  %v3702_v47 = vrot.slane %v3692_v37, %v4970_v33  ;;  %v3728_v48 = vcombine.high %v3692_v37, %v3692_v37 }
 0x283   : > { %3331 = vst.msk [vmem:[%s4990_s29 + $0x5b] sm:$0x1] %vm515_vm8, %v3323_v43  ;;  %v3503_v49 = vrot.slane %v3489_v44, %v4970_v33  ;;  %v3504_v50 = vcombine.high %v3496_v45, %v3496_v45  ;;  %3510 = vst.msk [vmem:[%s4990_s29 + $0x1c] sm:$0x1] %vm515_vm8, %v3496_v45  ;;  %v3522_v51 = vcombine.high %v3521_v40, %v3521_v40 }
 0x284   : > { %v3529_v52 = vrot.slane %v3521_v40, %v4970_v33  ;;  %3332 = vst.msk [vmem:[%s4990_s29 + $0x7b] sm:$0x1] %vm515_vm8, %v3324_v46  ;;  %v3703_v53 = vcombine.high %v3702_v47, %v3702_v47  ;;  %v3710_v54 = vrot.slane %v3702_v47, %v4970_v33  ;;  %v3735_v55 = vrot.slane %v3728_v48, %v4970_v33 }
 0x285   : > { %v3505_v56 = vcombine.high %v3503_v49, %v3503_v49  ;;  %3511 = vst.msk [vmem:[%s4990_s29 + $0x3c] sm:$0x1] %vm515_vm8, %v3503_v49  ;;  %3512 = vst.msk [vmem:[%s4990_s29 + $0x5c] sm:$0x1] %vm515_vm8, %v3504_v50  ;;  %v3536_v57 = vrot.slane %v3522_v51, %v4970_v33 }
 0x286   : > { %v3537_v58 = vcombine.high %v3529_v52, %v3529_v52  ;;  %3543 = vst.msk [vmem:[%s4990_s29 + $0x1d] sm:$0x1] %vm515_vm8, %v3529_v52  ;;  %v3717_v59 = vrot.slane %v3703_v53, %v4970_v33  ;;  %v3718_v60 = vcombine.high %v3710_v54, %v3710_v54  ;;  %3724 = vst.msk [vmem:[%s4990_s29 + $0x1e] sm:$0x1] %vm515_vm8, %v3710_v54 }
 0x287   : > { %v3736_v61 = vcombine.high %v3735_v55, %v3735_v55  ;;  %v3743_v62 = vrot.slane %v3735_v55, %v4970_v33  ;;  %3513 = vst.msk [vmem:[%s4990_s29 + $0x7c] sm:$0x1] %vm515_vm8, %v3505_v56  ;;  %v3538_v63 = vcombine.high %v3536_v57, %v3536_v57  ;;  %3544 = vst.msk [vmem:[%s4990_s29 + $0x3d] sm:$0x1] %vm515_vm8, %v3536_v57 }
 0x288   : > { %3545 = vst.msk [vmem:[%s4990_s29 + $0x5d] sm:$0x1] %vm515_vm8, %v3537_v58  ;;  %v3719_v0 = vcombine.high %v3717_v59, %v3717_v59  ;;  %3725 = vst.msk [vmem:[%s4990_s29 + $0x3e] sm:$0x1] %vm515_vm8, %v3717_v59 }
 0x289   : > { %3726 = vst.msk [vmem:[%s4990_s29 + $0x5e] sm:$0x1] %vm515_vm8, %v3718_v60  ;;  %v3750_v1 = vrot.slane %v3736_v61, %v4970_v33  ;;  %v3751_v2 = vcombine.high %v3743_v62, %v3743_v62  ;;  %3757 = vst.msk [vmem:[%s4990_s29 + $0x1f] sm:$0x1] %vm515_vm8, %v3743_v62 }
 0x28a   : > { %3546 = vst.msk [vmem:[%s4990_s29 + $0x7d] sm:$0x1] %vm515_vm8, %v3538_v63  ;;  %3727 = vst.msk [vmem:[%s4990_s29 + $0x7e] sm:$0x1] %vm515_vm8, %v3719_v0 }
 0x28b   : > { %v3752_v3 = vcombine.high %v3750_v1, %v3750_v1  ;;  %3758 = vst.msk [vmem:[%s4990_s29 + $0x3f] sm:$0x1] %vm515_vm8, %v3750_v1  ;;  %3759 = vst.msk [vmem:[%s4990_s29 + $0x5f] sm:$0x1] %vm515_vm8, %v3751_v2 }
 0x28d   : > { %3760 = vst.msk [vmem:[%s4990_s29 + $0x7f] sm:$0x1] %vm515_vm8, %v3752_v3 }
 0x28e   : > { %4382 = shalt.err (!%p4379_p5)
}
 0x28f   : > { %s4383_s18 = scalar_lea.hbm %s5337_s6, 2048  ;;  %s4387_s23 = scalar_lea.hbm %s5399_s3, 4096 }
 0x290   : > { %p4384_p6 = scmp.ne.s32.totalorder %s5337_s6, %s4383_s18  ;;  %p4388_p10 = scmp.lt.s32.totalorder %s5337_s6, %s5399_s3 }
 0x291   : > { %p4389_p11 = scmp.lt.s32.totalorder %s4387_s23, %s4383_s18 }
 0x292   : > { %p4385_p7 = pnand %p4384_p6, %p4523_p4 }
 0x293   : > { %p4390_p12 = por %p4389_p11, %p4388_p10 }
 0x294   : > { %p4386_p9 = pneg %p4385_p7 }
 0x296   : > { %p4391_p13 = pnand %p4390_p12, %p4386_p9 }
 0x298   : > { %4394 = shalt.err (!%p4391_p13)
}
 0x299   : > { %s4461_s28 = smov 128   ;;  %s4462_s29 = smov 8  }
 0x29a   : > { %4294 = dma.vmem_to_hbm [thread:$0]  (%p4523_p4), %s5339_s4, 2048, %s5337_s6, %s5351_s7, %s4461_s28, %s4461_s28, %s4462_s29  }
 0x29b PF: > { %p4300_p0 = scmp.ge.s32.totalorder %s4445_s17, 2  ;;  %s3792_s30 = sand.u32 1, %s4425_s12  }
 0x29c   : > { %s3793_s15 = scalar_lea.sflag [#allocation3], %s3792_s30 }
 0x29d   : > { %p4297_p1 = pnand %p4300_p0, %p4530_p8 }
 0x29f   : > { %p4298_p2 = pneg %p4297_p1 }
 0x2a1   : > { %4420 = dma.done.wait (%p4298_p2), %s3793_s15, 2048  }
 0x2a2   : > { %4422 = vsyncadd (%p4298_p2), %s3793_s15, 4294965248  ;;  %s16_s17 = sadd.s32 1, %s4445_s17   ;;  %s5410_s12 = smov %s4429_s13 }
 0x2a3   : > { %p13_p3 = scmp.ge.s32.totalorder %s16_s17, 4   ;;  %s5411_s13 = smov %s4433_s14 }
 0x2a4   : > { %s5412_s14 = smov %s4536_s25  ;;  %s5413_s15 = smov %s4441_s16 }
 0x2a5   : > { %s5414_s16 = smov %s5416_s20  ;;  %15 = sbr.rel (!%p13_p3) target bundleno = 4 (0x4), region = 67 }
 0x2aa   :  { %3798 = vsyncpa [#allocation3], 1 }
 0x2ab   :  { %3800 = vsyncpa [#allocation3 + $0x1], 1 }

</bundles_post_ra>
